<compile_context>
chip_gen: v7x
topology: tpu7x:2x2x1
jax: 0.10.0
libtpu: 0.0.40
codegen_flags: <defaults>
</compile_context>

<pallas_src>
import functools

import jax
import jax.numpy as jnp
from jax import lax
from jax.experimental import pallas as pl
from jax.experimental.pallas import tpu as pltpu


# Exact reciprocal keeps the 1e-4 check vs the pure-JAX reference; flip to True
# at production sizes (EUP vrcp rides an otherwise-free bundle slot).
_APPROX_RECIP = False
_NEG_INF = -1e9


# ----------------------------- kernel helpers --------------------------------


def _layernorm(x, gamma, beta, eps=1e-5):
    mean = jnp.mean(x, axis=-1, keepdims=True)
    var = jnp.mean((x - mean) ** 2, axis=-1, keepdims=True)
    return (x - mean) * lax.rsqrt(var + eps) * gamma + beta


def _mha_body(x, mask_bias, wqkv, wp, bp, gamma, beta, num_heads, compute_dtype):
    """Attention + residual + LN.

    wqkv : (E, 3E) lane-dense fused QKV weight  -> ONE MXU matmul for q/k/v.
    wp   : (E, E) projection weight with the reference's reversed-head concat
           already folded in as a row permutation (done in the wrapper), so a
           single (S,E)@(E,E) matmul replaces the per-head accumulate chain.
    """
    S, E = x.shape
    hs = E // num_heads

    qkv = jnp.dot(x.astype(compute_dtype), wqkv.astype(compute_dtype),
                  preferred_element_type=jnp.float32)             # (S, 3E), f32 acc

    vals = []
    for h in range(num_heads):
        qh = qkv[:, h * hs:(h + 1) * hs]
        kh = qkv[:, E + h * hs:E + (h + 1) * hs]
        vh = qkv[:, 2 * E + h * hs:2 * E + (h + 1) * hs]
        # q @ k^T without materializing a transpose (contract the hs dims).
        s = lax.dot_general(qh.astype(compute_dtype), kh.astype(compute_dtype),
                            (((1,), (1,)), ((), ())),
                            preferred_element_type=jnp.float32)   # (S, S)
        # NOTE: no 1/sqrt(head_size) scaling -- matches the PyTorch reference.
        s = s + mask_bias
        s = s - jnp.max(s, axis=-1, keepdims=True)
        p = jnp.exp(s)
        p = p * pl.reciprocal(jnp.sum(p, axis=-1, keepdims=True),
                              approx=_APPROX_RECIP)
        # TODO(synk): at real S convert this to flash-style online softmax over
        # K/V tiles instead of materializing the full (S, S) score matrix.
        vals.append(jnp.dot(p.astype(compute_dtype), vh.astype(compute_dtype),
                            preferred_element_type=jnp.float32))  # (S, hs)

    values = jnp.concatenate(vals, axis=-1)                       # (S, E)
    out = jnp.dot(values.astype(compute_dtype), wp.astype(compute_dtype),
                  preferred_element_type=jnp.float32) + bp + x
    return _layernorm(out, gamma, beta)


def _ffn_body(x, w1, b1, w2, b2, gamma, beta, compute_dtype):
    # TODO(synk): at real E (wf1/wf2 tens of MiB) tile the hidden dim with an
    # "arbitrary" grid axis / emit_pipeline instead of full resident blocks.
    h = jnp.dot(x.astype(compute_dtype), w1.astype(compute_dtype),
                preferred_element_type=jnp.float32) + b1
    h = jnp.maximum(h, 0.0)
    y = (jnp.dot(h.astype(compute_dtype), w2.astype(compute_dtype),
                 preferred_element_type=jnp.float32) + b2 + x)
    return _layernorm(y, gamma, beta)


def block_kernel(x_ref, wqkv1_ref, wp1_ref, wqkv2_ref, wp2_ref,
                 wf1_ref, bf1_ref, wf2_ref, vecs_ref, o_ref,
                 *, num_heads, compute_dtype):
    """Fused MHA -> MHA -> FFN for one batch element; intermediates stay in VMEM."""
    x = x_ref[0].astype(jnp.float32)                    # (S, E)
    S = x.shape[0]

    # Causal additive bias generated in-kernel (cheap VPU iota+select); removes
    # S*S*4 bytes of HBM traffic and 2x that of double-buffered VMEM.
    row = lax.broadcasted_iota(jnp.int32, (S, S), 0)
    col = lax.broadcasted_iota(jnp.int32, (S, S), 1)
    mask_bias = jnp.where(row >= col, 0.0, _NEG_INF).astype(jnp.float32)

    vecs = vecs_ref[...].astype(jnp.float32)            # (9, E) packed vectors
    bp1, g1, b1 = vecs[0:1], vecs[1:2], vecs[2:3]
    bp2, g2, b2 = vecs[3:4], vecs[4:5], vecs[5:6]
    bf2, gf, bf = vecs[6:7], vecs[7:8], vecs[8:9]

    y = _mha_body(x, mask_bias, wqkv1_ref[...], wp1_ref[...], bp1, g1, b1,
                  num_heads, compute_dtype)
    y = _mha_body(y, mask_bias, wqkv2_ref[...], wp2_ref[...], bp2, g2, b2,
                  num_heads, compute_dtype)
    y = _ffn_body(y, wf1_ref[...], bf1_ref[...], wf2_ref[...], bf2, gf, bf,
                  compute_dtype)
    # At real sizes keep E % 128 == 0 so this store is lane-dense (unmasked vst).
    o_ref[0] = y.astype(o_ref.dtype)


# ------------------------------- wrapper -------------------------------------


def _full(shape):
    # Grid-invariant full-array block.
    # TODO(synk): at real E add pipeline_mode=pl.Buffered(1) -- these blocks
    # never change with the grid, so default double-buffering only wastes VMEM.
    zeros = (0,) * len(shape)
    return pl.BlockSpec(shape, lambda b, z=zeros: z)


@functools.partial(jax.jit, static_argnames=("num_heads", "compute_dtype"))
def transformer_block_forward(x, mha1_params, mha2_params, ffn_params,
                              num_heads, compute_dtype=jnp.float32):
    B, S, E = x.shape
    assert E % num_heads == 0, "emb_size must be divisible by num_heads"
    hs = E // num_heads
    wq1, wk1, wv1, wp1, bp1, g1, b1 = mha1_params
    wq2, wk2, wv2, wp2, bp2, g2, b2 = mha2_params
    wf1, bf1, wf2, bf2, gf, bf = ffn_params
    Hf = wf1.shape[1]

    # Wrapper-side layout plumbing (free):
    #  * fused lane-dense QKV weights (E, 3E)
    #  * reference's reversed-head torch.cat folded into a row permutation of wp
    #  * nine (1, E) bias/gamma/beta vectors packed into one (9, E) array
    wqkv1 = jnp.concatenate([wq1, wk1, wv1], axis=1)
    wqkv2 = jnp.concatenate([wq2, wk2, wv2], axis=1)
    wp1p = wp1.reshape(num_heads, hs, E)[::-1].reshape(E, E)
    wp2p = wp2.reshape(num_heads, hs, E)[::-1].reshape(E, E)
    vecs = jnp.concatenate([bp1, g1, b1, bp2, g2, b2, bf2, gf, bf], axis=0)

    if compute_dtype != jnp.float32:
        # bf16 MXU operands (f32 accumulation preserved): pre-cast weights so
        # weight HBM traffic and VMEM footprint are halved as well.
        wqkv1, wp1p, wqkv2, wp2p, wf1, wf2 = (
            w.astype(compute_dtype)
            for w in (wqkv1, wp1p, wqkv2, wp2p, wf1, wf2))

    kern = functools.partial(block_kernel, num_heads=num_heads,
                             compute_dtype=compute_dtype)
    return pl.pallas_call(
        kern,
        out_shape=jax.ShapeDtypeStruct((B, S, E), x.dtype),
        grid=(B,),
        in_specs=[
            pl.BlockSpec((1, S, E), lambda b: (b, 0, 0)),    # x
            _full((E, 3 * E)), _full((E, E)),                # MHA 1 weights
            _full((E, 3 * E)), _full((E, E)),                # MHA 2 weights
            _full((E, Hf)), _full((1, Hf)), _full((Hf, E)),  # FFN weights
            _full(vecs.shape),                               # packed vectors
        ],
        out_specs=pl.BlockSpec((1, S, E), lambda b: (b, 0, 0)),
        compiler_params=pltpu.CompilerParams(
            # Batch elems shard across the 2 TensorCores on v7x; on single-TC
            # v5e/v6e an extra grid step costs only ~0.35us.
            # TODO(synk): at real sizes set vmem_limit_bytes per generation
            # (<=64 MiB on v7x, <=128 MiB on v5e/v6e) and add a parallel S-tile
            # grid axis so v7x stays busy when B is 1 or odd.
            dimension_semantics=("parallel",)),
    )(x, wqkv1, wp1p, wqkv2, wp2p, wf1, bf1, wf2, vecs)


# ------------------------- parameter construction ---------------------------


def xavier_uniform(key, shape, gain=1.0):
    # shape follows PyTorch Linear weight convention: (out_features, in_features)
    fan_out, fan_in = shape
    bound = gain * jnp.sqrt(6.0 / (fan_in + fan_out))
    return jax.random.uniform(key, shape, jnp.float32, -bound, bound)


def make_mha_params(key, emb, num_heads):
    hs = emb // num_heads
    keys = jax.random.split(key, 3 * num_heads + 2)
    # per-head weights, torch layout (hs, emb); concatenate their transposes so
    # head h occupies columns h*hs:(h+1)*hs of an (emb, emb) matrix.
    wq = jnp.concatenate(
        [xavier_uniform(keys[3 * h + 0], (hs, emb)).T for h in range(num_heads)], axis=1)
    wk = jnp.concatenate(
        [xavier_uniform(keys[3 * h + 1], (hs, emb)).T for h in range(num_heads)], axis=1)
    wv = jnp.concatenate(
        [xavier_uniform(keys[3 * h + 2], (hs, emb)).T for h in range(num_heads)], axis=1)
    wp = xavier_uniform(keys[-2], (emb, emb)).T                    # (E, E) pre-transposed
    bp = (jax.random.uniform(keys[-1], (1, emb), jnp.float32, -1.0, 1.0)
          / jnp.sqrt(jnp.float32(emb)))
    gamma = jnp.ones((1, emb), jnp.float32)
    beta = jnp.zeros((1, emb), jnp.float32)
    return (wq, wk, wv, wp, bp, gamma, beta)


def make_ffn_params(key, emb, hidden):
    k1, k2, k3, k4 = jax.random.split(key, 4)
    relu_gain = jnp.sqrt(2.0)                                      # calculate_gain('relu')
    w1 = xavier_uniform(k1, (hidden, emb), gain=relu_gain).T       # (E, Hf)
    b1 = (jax.random.uniform(k2, (1, hidden), jnp.float32, -1.0, 1.0)
          / jnp.sqrt(jnp.float32(emb)))
    w2 = xavier_uniform(k3, (emb, hidden), gain=relu_gain).T       # (Hf, E)
    b2 = (jax.random.uniform(k4, (1, emb), jnp.float32, -1.0, 1.0)
          / jnp.sqrt(jnp.float32(hidden)))
    gamma = jnp.ones((1, emb), jnp.float32)
    beta = jnp.zeros((1, emb), jnp.float32)
    return (w1, b1, w2, b2, gamma, beta)


# ------------------------------ reference -----------------------------------


def _ref_mha(x, params, num_heads):
    wq, wk, wv, wp, bp, gamma, beta = params
    B, S, E = x.shape
    hs = E // num_heads
    tril = jnp.tril(jnp.ones((S, S), jnp.float32))
    q = x @ wq
    k = x @ wk
    v = x @ wv
    vals = []
    for h in range(num_heads):
        att = q[..., h * hs:(h + 1) * hs] @ jnp.swapaxes(
            k[..., h * hs:(h + 1) * hs], -2, -1)
        att = jnp.where(tril == 0.0, -jnp.inf, att)    # torch masked_fill(-inf)
        att = jax.nn.softmax(att, axis=-1)
        vals.append(att @ v[..., h * hs:(h + 1) * hs])
    values = jnp.concatenate(vals[::-1], axis=-1)      # torch.cat((val, values))
    out = values @ wp + bp + x
    return _layernorm(out, gamma, beta)


def _ref_ffn(x, params):
    w1, b1, w2, b2, gamma, beta = params
    h = jnp.maximum(x @ w1 + b1, 0.0)
    y = h @ w2 + b2 + x
    return _layernorm(y, gamma, beta)


def _ref_block(x, p1, p2, pf, num_heads):
    return _ref_ffn(_ref_mha(_ref_mha(x, p1, num_heads), p2, num_heads), pf)


# -------------------------------- main ---------------------------------------


if __name__ == "__main__":
    emb_size = 32
    num_heads = 4
    context_size = 8          # sequence length equals context_size (as in module)
    batch = 2

    root = jax.random.PRNGKey(0)
    kx, k1, k2, k3 = jax.random.split(root, 4)

    x = jax.random.normal(kx, (batch, context_size, emb_size), jnp.float32)
    mha1_params = make_mha_params(k1, emb_size, num_heads)
    mha2_params = make_mha_params(k2, emb_size, num_heads)
    ffn_params = make_ffn_params(k3, emb_size, emb_size * 8)

    # f32 MXU-operand path: bit-tight validation vs the pure-JAX reference.
    out = transformer_block_forward(x, mha1_params, mha2_params, ffn_params,
                                    num_heads=num_heads)
    out = jax.block_until_ready(out)

    ref = _ref_block(x, mha1_params, mha2_params, ffn_params, num_heads)
    assert out.shape == (batch, context_size, emb_size)
    assert jnp.allclose(out, ref, atol=1e-4, rtol=1e-4), \
        "mismatch vs pure-JAX reference (f32 path)"

    # bf16 MXU-operand path (the review's v5e/v6e/v7x change): f32 accumulation
    # and f32 elementwise retained, so only operand rounding differs.
    out_bf16 = transformer_block_forward(x, mha1_params, mha2_params, ffn_params,
                                         num_heads=num_heads,
                                         compute_dtype=jnp.bfloat16)
    out_bf16 = jax.block_until_ready(out_bf16)
    assert jnp.allclose(out_bf16, ref, atol=2.5e-1, rtol=5e-2), \
        "bf16 MXU path diverged beyond bf16 rounding tolerance"

    print("KERNEL_OK")
</pallas_src>

<mosaic_0001>
module attributes {stable_mosaic.version = 11 : i64} {
  func.func @block_kernel(%arg0: i32, %arg1: memref<1x8x32xf32, #tpu.memory_space<vmem>>, %arg2: memref<32x96xf32, #tpu.memory_space<vmem>>, %arg3: memref<32x32xf32, #tpu.memory_space<vmem>>, %arg4: memref<32x96xf32, #tpu.memory_space<vmem>>, %arg5: memref<32x32xf32, #tpu.memory_space<vmem>>, %arg6: memref<32x256xf32, #tpu.memory_space<vmem>>, %arg7: memref<1x256xf32, #tpu.memory_space<vmem>>, %arg8: memref<256x32xf32, #tpu.memory_space<vmem>>, %arg9: memref<9x32xf32, #tpu.memory_space<vmem>>, %arg10: memref<1x8x32xf32, #tpu.memory_space<vmem>>) attributes {dimension_semantics = [#tpu.dimension_semantics<parallel>], iteration_bounds = array<i64: 2>, scalar_prefetch = 0 : i64, scratch_operands = 0 : i64, tpu.core_type = #tpu.core_type<tc>, window_params = [{transform_indices = @transform_0, window_bounds = array<i64: 1, 8, 32>}, {pipeline_mode = #tpu.pipeline_mode<synchronous>, transform_indices = @transform_1, window_bounds = array<i64: 32, 96>}, {pipeline_mode = #tpu.pipeline_mode<synchronous>, transform_indices = @transform_2, window_bounds = array<i64: 32, 32>}, {pipeline_mode = #tpu.pipeline_mode<synchronous>, transform_indices = @transform_3, window_bounds = array<i64: 32, 96>}, {pipeline_mode = #tpu.pipeline_mode<synchronous>, transform_indices = @transform_4, window_bounds = array<i64: 32, 32>}, {pipeline_mode = #tpu.pipeline_mode<synchronous>, transform_indices = @transform_5, window_bounds = array<i64: 32, 256>}, {pipeline_mode = #tpu.pipeline_mode<synchronous>, transform_indices = @transform_6, window_bounds = array<i64: 1, 256>}, {pipeline_mode = #tpu.pipeline_mode<synchronous>, transform_indices = @transform_7, window_bounds = array<i64: 256, 32>}, {pipeline_mode = #tpu.pipeline_mode<synchronous>, transform_indices = @transform_8, window_bounds = array<i64: 9, 32>}, {transform_indices = @transform_9, window_bounds = array<i64: 1, 8, 32>}]} {
    %c0 = arith.constant 0 : index
    %c0_0 = arith.constant 0 : index
    %c0_1 = arith.constant 0 : index
    %0 = vector.load %arg1[%c0, %c0_0, %c0_1] : memref<1x8x32xf32, #tpu.memory_space<vmem>>, vector<1x8x32xf32>
    %1 = vector.shape_cast %0 : vector<1x8x32xf32> to vector<8x32xf32>
    %2 = tpu.iota {dimensions = array<i32: 0>} : vector<8x8xi32>
    %3 = tpu.iota {dimensions = array<i32: 1>} : vector<8x8xi32>
    %4 = arith.cmpi sge, %2, %3 : vector<8x8xi32>
    %cst = arith.constant 0.000000e+00 : f32
    %cst_2 = arith.constant -1.000000e+09 : f32
    %5 = vector.broadcast %cst : f32 to vector<8x8xf32>
    %6 = vector.broadcast %cst_2 : f32 to vector<8x8xf32>
    %7 = arith.select %4, %5, %6 : vector<8x8xi1>, vector<8x8xf32>
    %c0_3 = arith.constant 0 : index
    %c0_4 = arith.constant 0 : index
    %8 = vector.load %arg9[%c0_3, %c0_4] : memref<9x32xf32, #tpu.memory_space<vmem>>, vector<9x32xf32>
    %9 = vector.extract_strided_slice %8 {offsets = [0, 0], sizes = [1, 32], strides = [1, 1]} : vector<9x32xf32> to vector<1x32xf32>
    %10 = vector.extract_strided_slice %8 {offsets = [1, 0], sizes = [1, 32], strides = [1, 1]} : vector<9x32xf32> to vector<1x32xf32>
    %11 = vector.extract_strided_slice %8 {offsets = [2, 0], sizes = [1, 32], strides = [1, 1]} : vector<9x32xf32> to vector<1x32xf32>
    %12 = vector.extract_strided_slice %8 {offsets = [3, 0], sizes = [1, 32], strides = [1, 1]} : vector<9x32xf32> to vector<1x32xf32>
    %13 = vector.extract_strided_slice %8 {offsets = [4, 0], sizes = [1, 32], strides = [1, 1]} : vector<9x32xf32> to vector<1x32xf32>
    %14 = vector.extract_strided_slice %8 {offsets = [5, 0], sizes = [1, 32], strides = [1, 1]} : vector<9x32xf32> to vector<1x32xf32>
    %15 = vector.extract_strided_slice %8 {offsets = [6, 0], sizes = [1, 32], strides = [1, 1]} : vector<9x32xf32> to vector<1x32xf32>
    %16 = vector.extract_strided_slice %8 {offsets = [7, 0], sizes = [1, 32], strides = [1, 1]} : vector<9x32xf32> to vector<1x32xf32>
    %17 = vector.extract_strided_slice %8 {offsets = [8, 0], sizes = [1, 32], strides = [1, 1]} : vector<9x32xf32> to vector<1x32xf32>
    %c0_5 = arith.constant 0 : index
    %c0_6 = arith.constant 0 : index
    %18 = vector.load %arg2[%c0_5, %c0_6] : memref<32x96xf32, #tpu.memory_space<vmem>>, vector<32x96xf32>
    %c0_7 = arith.constant 0 : index
    %c0_8 = arith.constant 0 : index
    %19 = vector.load %arg3[%c0_7, %c0_8] : memref<32x32xf32, #tpu.memory_space<vmem>>, vector<32x32xf32>
    %cst_9 = arith.constant dense<0.000000e+00> : vector<8x96xf32>
    %20 = tpu.matmul %1, %18, %cst_9 {dimension_numbers = #tpu.dot_dimension_numbers<[1], [0], [0], [1], [0, 0, 1, 1], [], []>} : vector<8x32xf32>, vector<32x96xf32>, vector<8x96xf32> -> vector<8x96xf32>
    %21 = vector.extract_strided_slice %20 {offsets = [0, 0], sizes = [8, 8], strides = [1, 1]} : vector<8x96xf32> to vector<8x8xf32>
    %22 = vector.extract_strided_slice %20 {offsets = [0, 32], sizes = [8, 8], strides = [1, 1]} : vector<8x96xf32> to vector<8x8xf32>
    %23 = vector.extract_strided_slice %20 {offsets = [0, 64], sizes = [8, 8], strides = [1, 1]} : vector<8x96xf32> to vector<8x8xf32>
    %cst_10 = arith.constant dense<0.000000e+00> : vector<8x8xf32>
    %24 = tpu.matmul %21, %22, %cst_10 {dimension_numbers = #tpu.dot_dimension_numbers<[1], [1], [0], [0], [0, 0, 1, 0], [], []>} : vector<8x8xf32>, vector<8x8xf32>, vector<8x8xf32> -> vector<8x8xf32>
    %25 = arith.addf %24, %7 : vector<8x8xf32>
    %cst_11 = arith.constant dense<0xFF800000> : vector<8xf32>
    %26 = vector.multi_reduction <maximumf>, %25, %cst_11 [1] : vector<8x8xf32> to vector<8xf32>
    %27 = vector.shape_cast %26 : vector<8xf32> to vector<8x1xf32>
    %28 = vector.broadcast %27 : vector<8x1xf32> to vector<8x8xf32>
    %29 = arith.subf %25, %28 : vector<8x8xf32>
    %30 = math.exp %29 : vector<8x8xf32>
    %cst_12 = arith.constant dense<0.000000e+00> : vector<8xf32>
    %31 = vector.multi_reduction <add>, %30, %cst_12 [1] : vector<8x8xf32> to vector<8xf32>
    %32 = vector.shape_cast %31 : vector<8xf32> to vector<8x1xf32>
    %33 = tpu.reciprocal %32 : vector<8x1xf32> -> vector<8x1xf32>
    %34 = vector.broadcast %33 : vector<8x1xf32> to vector<8x8xf32>
    %35 = arith.mulf %30, %34 : vector<8x8xf32>
    %cst_13 = arith.constant dense<0.000000e+00> : vector<8x8xf32>
    %36 = tpu.matmul %35, %23, %cst_13 {dimension_numbers = #tpu.dot_dimension_numbers<[1], [0], [0], [1], [0, 0, 1, 1], [], []>} : vector<8x8xf32>, vector<8x8xf32>, vector<8x8xf32> -> vector<8x8xf32>
    %37 = vector.extract_strided_slice %20 {offsets = [0, 8], sizes = [8, 8], strides = [1, 1]} : vector<8x96xf32> to vector<8x8xf32>
    %38 = vector.extract_strided_slice %20 {offsets = [0, 40], sizes = [8, 8], strides = [1, 1]} : vector<8x96xf32> to vector<8x8xf32>
    %39 = vector.extract_strided_slice %20 {offsets = [0, 72], sizes = [8, 8], strides = [1, 1]} : vector<8x96xf32> to vector<8x8xf32>
    %cst_14 = arith.constant dense<0.000000e+00> : vector<8x8xf32>
    %40 = tpu.matmul %37, %38, %cst_14 {dimension_numbers = #tpu.dot_dimension_numbers<[1], [1], [0], [0], [0, 0, 1, 0], [], []>} : vector<8x8xf32>, vector<8x8xf32>, vector<8x8xf32> -> vector<8x8xf32>
    %41 = arith.addf %40, %7 : vector<8x8xf32>
    %cst_15 = arith.constant dense<0xFF800000> : vector<8xf32>
    %42 = vector.multi_reduction <maximumf>, %41, %cst_15 [1] : vector<8x8xf32> to vector<8xf32>
    %43 = vector.shape_cast %42 : vector<8xf32> to vector<8x1xf32>
    %44 = vector.broadcast %43 : vector<8x1xf32> to vector<8x8xf32>
    %45 = arith.subf %41, %44 : vector<8x8xf32>
    %46 = math.exp %45 : vector<8x8xf32>
    %cst_16 = arith.constant dense<0.000000e+00> : vector<8xf32>
    %47 = vector.multi_reduction <add>, %46, %cst_16 [1] : vector<8x8xf32> to vector<8xf32>
    %48 = vector.shape_cast %47 : vector<8xf32> to vector<8x1xf32>
    %49 = tpu.reciprocal %48 : vector<8x1xf32> -> vector<8x1xf32>
    %50 = vector.broadcast %49 : vector<8x1xf32> to vector<8x8xf32>
    %51 = arith.mulf %46, %50 : vector<8x8xf32>
    %cst_17 = arith.constant dense<0.000000e+00> : vector<8x8xf32>
    %52 = tpu.matmul %51, %39, %cst_17 {dimension_numbers = #tpu.dot_dimension_numbers<[1], [0], [0], [1], [0, 0, 1, 1], [], []>} : vector<8x8xf32>, vector<8x8xf32>, vector<8x8xf32> -> vector<8x8xf32>
    %53 = vector.extract_strided_slice %20 {offsets = [0, 16], sizes = [8, 8], strides = [1, 1]} : vector<8x96xf32> to vector<8x8xf32>
    %54 = vector.extract_strided_slice %20 {offsets = [0, 48], sizes = [8, 8], strides = [1, 1]} : vector<8x96xf32> to vector<8x8xf32>
    %55 = vector.extract_strided_slice %20 {offsets = [0, 80], sizes = [8, 8], strides = [1, 1]} : vector<8x96xf32> to vector<8x8xf32>
    %cst_18 = arith.constant dense<0.000000e+00> : vector<8x8xf32>
    %56 = tpu.matmul %53, %54, %cst_18 {dimension_numbers = #tpu.dot_dimension_numbers<[1], [1], [0], [0], [0, 0, 1, 0], [], []>} : vector<8x8xf32>, vector<8x8xf32>, vector<8x8xf32> -> vector<8x8xf32>
    %57 = arith.addf %56, %7 : vector<8x8xf32>
    %cst_19 = arith.constant dense<0xFF800000> : vector<8xf32>
    %58 = vector.multi_reduction <maximumf>, %57, %cst_19 [1] : vector<8x8xf32> to vector<8xf32>
    %59 = vector.shape_cast %58 : vector<8xf32> to vector<8x1xf32>
    %60 = vector.broadcast %59 : vector<8x1xf32> to vector<8x8xf32>
    %61 = arith.subf %57, %60 : vector<8x8xf32>
    %62 = math.exp %61 : vector<8x8xf32>
    %cst_20 = arith.constant dense<0.000000e+00> : vector<8xf32>
    %63 = vector.multi_reduction <add>, %62, %cst_20 [1] : vector<8x8xf32> to vector<8xf32>
    %64 = vector.shape_cast %63 : vector<8xf32> to vector<8x1xf32>
    %65 = tpu.reciprocal %64 : vector<8x1xf32> -> vector<8x1xf32>
    %66 = vector.broadcast %65 : vector<8x1xf32> to vector<8x8xf32>
    %67 = arith.mulf %62, %66 : vector<8x8xf32>
    %cst_21 = arith.constant dense<0.000000e+00> : vector<8x8xf32>
    %68 = tpu.matmul %67, %55, %cst_21 {dimension_numbers = #tpu.dot_dimension_numbers<[1], [0], [0], [1], [0, 0, 1, 1], [], []>} : vector<8x8xf32>, vector<8x8xf32>, vector<8x8xf32> -> vector<8x8xf32>
    %69 = vector.extract_strided_slice %20 {offsets = [0, 24], sizes = [8, 8], strides = [1, 1]} : vector<8x96xf32> to vector<8x8xf32>
    %70 = vector.extract_strided_slice %20 {offsets = [0, 56], sizes = [8, 8], strides = [1, 1]} : vector<8x96xf32> to vector<8x8xf32>
    %71 = vector.extract_strided_slice %20 {offsets = [0, 88], sizes = [8, 8], strides = [1, 1]} : vector<8x96xf32> to vector<8x8xf32>
    %cst_22 = arith.constant dense<0.000000e+00> : vector<8x8xf32>
    %72 = tpu.matmul %69, %70, %cst_22 {dimension_numbers = #tpu.dot_dimension_numbers<[1], [1], [0], [0], [0, 0, 1, 0], [], []>} : vector<8x8xf32>, vector<8x8xf32>, vector<8x8xf32> -> vector<8x8xf32>
    %73 = arith.addf %72, %7 : vector<8x8xf32>
    %cst_23 = arith.constant dense<0xFF800000> : vector<8xf32>
    %74 = vector.multi_reduction <maximumf>, %73, %cst_23 [1] : vector<8x8xf32> to vector<8xf32>
    %75 = vector.shape_cast %74 : vector<8xf32> to vector<8x1xf32>
    %76 = vector.broadcast %75 : vector<8x1xf32> to vector<8x8xf32>
    %77 = arith.subf %73, %76 : vector<8x8xf32>
    %78 = math.exp %77 : vector<8x8xf32>
    %cst_24 = arith.constant dense<0.000000e+00> : vector<8xf32>
    %79 = vector.multi_reduction <add>, %78, %cst_24 [1] : vector<8x8xf32> to vector<8xf32>
    %80 = vector.shape_cast %79 : vector<8xf32> to vector<8x1xf32>
    %81 = tpu.reciprocal %80 : vector<8x1xf32> -> vector<8x1xf32>
    %82 = vector.broadcast %81 : vector<8x1xf32> to vector<8x8xf32>
    %83 = arith.mulf %78, %82 : vector<8x8xf32>
    %cst_25 = arith.constant dense<0.000000e+00> : vector<8x8xf32>
    %84 = tpu.matmul %83, %71, %cst_25 {dimension_numbers = #tpu.dot_dimension_numbers<[1], [0], [0], [1], [0, 0, 1, 1], [], []>} : vector<8x8xf32>, vector<8x8xf32>, vector<8x8xf32> -> vector<8x8xf32>
    %85 = tpu.concatenate %36, %52, %68, %84 in 1 : vector<8x8xf32>, vector<8x8xf32>, vector<8x8xf32>, vector<8x8xf32> -> vector<8x32xf32>
    %cst_26 = arith.constant dense<0.000000e+00> : vector<8x32xf32>
    %86 = tpu.matmul %85, %19, %cst_26 {dimension_numbers = #tpu.dot_dimension_numbers<[1], [0], [0], [1], [0, 0, 1, 1], [], []>} : vector<8x32xf32>, vector<32x32xf32>, vector<8x32xf32> -> vector<8x32xf32>
    %87 = vector.broadcast %9 : vector<1x32xf32> to vector<8x32xf32>
    %88 = arith.addf %86, %87 : vector<8x32xf32>
    %89 = arith.addf %88, %1 : vector<8x32xf32>
    %cst_27 = arith.constant dense<0.000000e+00> : vector<8xf32>
    %90 = vector.multi_reduction <add>, %89, %cst_27 [1] : vector<8x32xf32> to vector<8xf32>
    %91 = vector.shape_cast %90 : vector<8xf32> to vector<8x1xf32>
    %cst_28 = arith.constant 3.200000e+01 : f32
    %92 = vector.broadcast %cst_28 : f32 to vector<8x1xf32>
    %93 = arith.divf %91, %92 : vector<8x1xf32>
    %94 = vector.broadcast %93 : vector<8x1xf32> to vector<8x32xf32>
    %95 = arith.subf %89, %94 : vector<8x32xf32>
    %96 = arith.mulf %95, %95 : vector<8x32xf32>
    %cst_29 = arith.constant dense<0.000000e+00> : vector<8xf32>
    %97 = vector.multi_reduction <add>, %96, %cst_29 [1] : vector<8x32xf32> to vector<8xf32>
    %98 = vector.shape_cast %97 : vector<8xf32> to vector<8x1xf32>
    %cst_30 = arith.constant 3.200000e+01 : f32
    %99 = vector.broadcast %cst_30 : f32 to vector<8x1xf32>
    %100 = arith.divf %98, %99 : vector<8x1xf32>
    %101 = vector.broadcast %93 : vector<8x1xf32> to vector<8x32xf32>
    %102 = arith.subf %89, %101 : vector<8x32xf32>
    %cst_31 = arith.constant 9.99999974E-6 : f32
    %103 = vector.broadcast %cst_31 : f32 to vector<8x1xf32>
    %104 = arith.addf %100, %103 : vector<8x1xf32>
    %105 = math.rsqrt %104 : vector<8x1xf32>
    %106 = vector.broadcast %105 : vector<8x1xf32> to vector<8x32xf32>
    %107 = arith.mulf %102, %106 : vector<8x32xf32>
    %108 = vector.broadcast %10 : vector<1x32xf32> to vector<8x32xf32>
    %109 = arith.mulf %107, %108 : vector<8x32xf32>
    %110 = vector.broadcast %11 : vector<1x32xf32> to vector<8x32xf32>
    %111 = arith.addf %109, %110 : vector<8x32xf32>
    %c0_32 = arith.constant 0 : index
    %c0_33 = arith.constant 0 : index
    %112 = vector.load %arg4[%c0_32, %c0_33] : memref<32x96xf32, #tpu.memory_space<vmem>>, vector<32x96xf32>
    %c0_34 = arith.constant 0 : index
    %c0_35 = arith.constant 0 : index
    %113 = vector.load %arg5[%c0_34, %c0_35] : memref<32x32xf32, #tpu.memory_space<vmem>>, vector<32x32xf32>
    %cst_36 = arith.constant dense<0.000000e+00> : vector<8x96xf32>
    %114 = tpu.matmul %111, %112, %cst_36 {dimension_numbers = #tpu.dot_dimension_numbers<[1], [0], [0], [1], [0, 0, 1, 1], [], []>} : vector<8x32xf32>, vector<32x96xf32>, vector<8x96xf32> -> vector<8x96xf32>
    %115 = vector.extract_strided_slice %114 {offsets = [0, 0], sizes = [8, 8], strides = [1, 1]} : vector<8x96xf32> to vector<8x8xf32>
    %116 = vector.extract_strided_slice %114 {offsets = [0, 32], sizes = [8, 8], strides = [1, 1]} : vector<8x96xf32> to vector<8x8xf32>
    %117 = vector.extract_strided_slice %114 {offsets = [0, 64], sizes = [8, 8], strides = [1, 1]} : vector<8x96xf32> to vector<8x8xf32>
    %cst_37 = arith.constant dense<0.000000e+00> : vector<8x8xf32>
    %118 = tpu.matmul %115, %116, %cst_37 {dimension_numbers = #tpu.dot_dimension_numbers<[1], [1], [0], [0], [0, 0, 1, 0], [], []>} : vector<8x8xf32>, vector<8x8xf32>, vector<8x8xf32> -> vector<8x8xf32>
    %119 = arith.addf %118, %7 : vector<8x8xf32>
    %cst_38 = arith.constant dense<0xFF800000> : vector<8xf32>
    %120 = vector.multi_reduction <maximumf>, %119, %cst_38 [1] : vector<8x8xf32> to vector<8xf32>
    %121 = vector.shape_cast %120 : vector<8xf32> to vector<8x1xf32>
    %122 = vector.broadcast %121 : vector<8x1xf32> to vector<8x8xf32>
    %123 = arith.subf %119, %122 : vector<8x8xf32>
    %124 = math.exp %123 : vector<8x8xf32>
    %cst_39 = arith.constant dense<0.000000e+00> : vector<8xf32>
    %125 = vector.multi_reduction <add>, %124, %cst_39 [1] : vector<8x8xf32> to vector<8xf32>
    %126 = vector.shape_cast %125 : vector<8xf32> to vector<8x1xf32>
    %127 = tpu.reciprocal %126 : vector<8x1xf32> -> vector<8x1xf32>
    %128 = vector.broadcast %127 : vector<8x1xf32> to vector<8x8xf32>
    %129 = arith.mulf %124, %128 : vector<8x8xf32>
    %cst_40 = arith.constant dense<0.000000e+00> : vector<8x8xf32>
    %130 = tpu.matmul %129, %117, %cst_40 {dimension_numbers = #tpu.dot_dimension_numbers<[1], [0], [0], [1], [0, 0, 1, 1], [], []>} : vector<8x8xf32>, vector<8x8xf32>, vector<8x8xf32> -> vector<8x8xf32>
    %131 = vector.extract_strided_slice %114 {offsets = [0, 8], sizes = [8, 8], strides = [1, 1]} : vector<8x96xf32> to vector<8x8xf32>
    %132 = vector.extract_strided_slice %114 {offsets = [0, 40], sizes = [8, 8], strides = [1, 1]} : vector<8x96xf32> to vector<8x8xf32>
    %133 = vector.extract_strided_slice %114 {offsets = [0, 72], sizes = [8, 8], strides = [1, 1]} : vector<8x96xf32> to vector<8x8xf32>
    %cst_41 = arith.constant dense<0.000000e+00> : vector<8x8xf32>
    %134 = tpu.matmul %131, %132, %cst_41 {dimension_numbers = #tpu.dot_dimension_numbers<[1], [1], [0], [0], [0, 0, 1, 0], [], []>} : vector<8x8xf32>, vector<8x8xf32>, vector<8x8xf32> -> vector<8x8xf32>
    %135 = arith.addf %134, %7 : vector<8x8xf32>
    %cst_42 = arith.constant dense<0xFF800000> : vector<8xf32>
    %136 = vector.multi_reduction <maximumf>, %135, %cst_42 [1] : vector<8x8xf32> to vector<8xf32>
    %137 = vector.shape_cast %136 : vector<8xf32> to vector<8x1xf32>
    %138 = vector.broadcast %137 : vector<8x1xf32> to vector<8x8xf32>
    %139 = arith.subf %135, %138 : vector<8x8xf32>
    %140 = math.exp %139 : vector<8x8xf32>
    %cst_43 = arith.constant dense<0.000000e+00> : vector<8xf32>
    %141 = vector.multi_reduction <add>, %140, %cst_43 [1] : vector<8x8xf32> to vector<8xf32>
    %142 = vector.shape_cast %141 : vector<8xf32> to vector<8x1xf32>
    %143 = tpu.reciprocal %142 : vector<8x1xf32> -> vector<8x1xf32>
    %144 = vector.broadcast %143 : vector<8x1xf32> to vector<8x8xf32>
    %145 = arith.mulf %140, %144 : vector<8x8xf32>
    %cst_44 = arith.constant dense<0.000000e+00> : vector<8x8xf32>
    %146 = tpu.matmul %145, %133, %cst_44 {dimension_numbers = #tpu.dot_dimension_numbers<[1], [0], [0], [1], [0, 0, 1, 1], [], []>} : vector<8x8xf32>, vector<8x8xf32>, vector<8x8xf32> -> vector<8x8xf32>
    %147 = vector.extract_strided_slice %114 {offsets = [0, 16], sizes = [8, 8], strides = [1, 1]} : vector<8x96xf32> to vector<8x8xf32>
    %148 = vector.extract_strided_slice %114 {offsets = [0, 48], sizes = [8, 8], strides = [1, 1]} : vector<8x96xf32> to vector<8x8xf32>
    %149 = vector.extract_strided_slice %114 {offsets = [0, 80], sizes = [8, 8], strides = [1, 1]} : vector<8x96xf32> to vector<8x8xf32>
    %cst_45 = arith.constant dense<0.000000e+00> : vector<8x8xf32>
    %150 = tpu.matmul %147, %148, %cst_45 {dimension_numbers = #tpu.dot_dimension_numbers<[1], [1], [0], [0], [0, 0, 1, 0], [], []>} : vector<8x8xf32>, vector<8x8xf32>, vector<8x8xf32> -> vector<8x8xf32>
    %151 = arith.addf %150, %7 : vector<8x8xf32>
    %cst_46 = arith.constant dense<0xFF800000> : vector<8xf32>
    %152 = vector.multi_reduction <maximumf>, %151, %cst_46 [1] : vector<8x8xf32> to vector<8xf32>
    %153 = vector.shape_cast %152 : vector<8xf32> to vector<8x1xf32>
    %154 = vector.broadcast %153 : vector<8x1xf32> to vector<8x8xf32>
    %155 = arith.subf %151, %154 : vector<8x8xf32>
    %156 = math.exp %155 : vector<8x8xf32>
    %cst_47 = arith.constant dense<0.000000e+00> : vector<8xf32>
    %157 = vector.multi_reduction <add>, %156, %cst_47 [1] : vector<8x8xf32> to vector<8xf32>
    %158 = vector.shape_cast %157 : vector<8xf32> to vector<8x1xf32>
    %159 = tpu.reciprocal %158 : vector<8x1xf32> -> vector<8x1xf32>
    %160 = vector.broadcast %159 : vector<8x1xf32> to vector<8x8xf32>
    %161 = arith.mulf %156, %160 : vector<8x8xf32>
    %cst_48 = arith.constant dense<0.000000e+00> : vector<8x8xf32>
    %162 = tpu.matmul %161, %149, %cst_48 {dimension_numbers = #tpu.dot_dimension_numbers<[1], [0], [0], [1], [0, 0, 1, 1], [], []>} : vector<8x8xf32>, vector<8x8xf32>, vector<8x8xf32> -> vector<8x8xf32>
    %163 = vector.extract_strided_slice %114 {offsets = [0, 24], sizes = [8, 8], strides = [1, 1]} : vector<8x96xf32> to vector<8x8xf32>
    %164 = vector.extract_strided_slice %114 {offsets = [0, 56], sizes = [8, 8], strides = [1, 1]} : vector<8x96xf32> to vector<8x8xf32>
    %165 = vector.extract_strided_slice %114 {offsets = [0, 88], sizes = [8, 8], strides = [1, 1]} : vector<8x96xf32> to vector<8x8xf32>
    %cst_49 = arith.constant dense<0.000000e+00> : vector<8x8xf32>
    %166 = tpu.matmul %163, %164, %cst_49 {dimension_numbers = #tpu.dot_dimension_numbers<[1], [1], [0], [0], [0, 0, 1, 0], [], []>} : vector<8x8xf32>, vector<8x8xf32>, vector<8x8xf32> -> vector<8x8xf32>
    %167 = arith.addf %166, %7 : vector<8x8xf32>
    %cst_50 = arith.constant dense<0xFF800000> : vector<8xf32>
    %168 = vector.multi_reduction <maximumf>, %167, %cst_50 [1] : vector<8x8xf32> to vector<8xf32>
    %169 = vector.shape_cast %168 : vector<8xf32> to vector<8x1xf32>
    %170 = vector.broadcast %169 : vector<8x1xf32> to vector<8x8xf32>
    %171 = arith.subf %167, %170 : vector<8x8xf32>
    %172 = math.exp %171 : vector<8x8xf32>
    %cst_51 = arith.constant dense<0.000000e+00> : vector<8xf32>
    %173 = vector.multi_reduction <add>, %172, %cst_51 [1] : vector<8x8xf32> to vector<8xf32>
    %174 = vector.shape_cast %173 : vector<8xf32> to vector<8x1xf32>
    %175 = tpu.reciprocal %174 : vector<8x1xf32> -> vector<8x1xf32>
    %176 = vector.broadcast %175 : vector<8x1xf32> to vector<8x8xf32>
    %177 = arith.mulf %172, %176 : vector<8x8xf32>
    %cst_52 = arith.constant dense<0.000000e+00> : vector<8x8xf32>
    %178 = tpu.matmul %177, %165, %cst_52 {dimension_numbers = #tpu.dot_dimension_numbers<[1], [0], [0], [1], [0, 0, 1, 1], [], []>} : vector<8x8xf32>, vector<8x8xf32>, vector<8x8xf32> -> vector<8x8xf32>
    %179 = tpu.concatenate %130, %146, %162, %178 in 1 : vector<8x8xf32>, vector<8x8xf32>, vector<8x8xf32>, vector<8x8xf32> -> vector<8x32xf32>
    %cst_53 = arith.constant dense<0.000000e+00> : vector<8x32xf32>
    %180 = tpu.matmul %179, %113, %cst_53 {dimension_numbers = #tpu.dot_dimension_numbers<[1], [0], [0], [1], [0, 0, 1, 1], [], []>} : vector<8x32xf32>, vector<32x32xf32>, vector<8x32xf32> -> vector<8x32xf32>
    %181 = vector.broadcast %12 : vector<1x32xf32> to vector<8x32xf32>
    %182 = arith.addf %180, %181 : vector<8x32xf32>
    %183 = arith.addf %182, %111 : vector<8x32xf32>
    %cst_54 = arith.constant dense<0.000000e+00> : vector<8xf32>
    %184 = vector.multi_reduction <add>, %183, %cst_54 [1] : vector<8x32xf32> to vector<8xf32>
    %185 = vector.shape_cast %184 : vector<8xf32> to vector<8x1xf32>
    %cst_55 = arith.constant 3.200000e+01 : f32
    %186 = vector.broadcast %cst_55 : f32 to vector<8x1xf32>
    %187 = arith.divf %185, %186 : vector<8x1xf32>
    %188 = vector.broadcast %187 : vector<8x1xf32> to vector<8x32xf32>
    %189 = arith.subf %183, %188 : vector<8x32xf32>
    %190 = arith.mulf %189, %189 : vector<8x32xf32>
    %cst_56 = arith.constant dense<0.000000e+00> : vector<8xf32>
    %191 = vector.multi_reduction <add>, %190, %cst_56 [1] : vector<8x32xf32> to vector<8xf32>
    %192 = vector.shape_cast %191 : vector<8xf32> to vector<8x1xf32>
    %cst_57 = arith.constant 3.200000e+01 : f32
    %193 = vector.broadcast %cst_57 : f32 to vector<8x1xf32>
    %194 = arith.divf %192, %193 : vector<8x1xf32>
    %195 = vector.broadcast %187 : vector<8x1xf32> to vector<8x32xf32>
    %196 = arith.subf %183, %195 : vector<8x32xf32>
    %cst_58 = arith.constant 9.99999974E-6 : f32
    %197 = vector.broadcast %cst_58 : f32 to vector<8x1xf32>
    %198 = arith.addf %194, %197 : vector<8x1xf32>
    %199 = math.rsqrt %198 : vector<8x1xf32>
    %200 = vector.broadcast %199 : vector<8x1xf32> to vector<8x32xf32>
    %201 = arith.mulf %196, %200 : vector<8x32xf32>
    %202 = vector.broadcast %13 : vector<1x32xf32> to vector<8x32xf32>
    %203 = arith.mulf %201, %202 : vector<8x32xf32>
    %204 = vector.broadcast %14 : vector<1x32xf32> to vector<8x32xf32>
    %205 = arith.addf %203, %204 : vector<8x32xf32>
    %c0_59 = arith.constant 0 : index
    %c0_60 = arith.constant 0 : index
    %206 = vector.load %arg6[%c0_59, %c0_60] : memref<32x256xf32, #tpu.memory_space<vmem>>, vector<32x256xf32>
    %c0_61 = arith.constant 0 : index
    %c0_62 = arith.constant 0 : index
    %207 = vector.load %arg7[%c0_61, %c0_62] : memref<1x256xf32, #tpu.memory_space<vmem>>, vector<1x256xf32>
    %c0_63 = arith.constant 0 : index
    %c0_64 = arith.constant 0 : index
    %208 = vector.load %arg8[%c0_63, %c0_64] : memref<256x32xf32, #tpu.memory_space<vmem>>, vector<256x32xf32>
    %cst_65 = arith.constant dense<0.000000e+00> : vector<8x256xf32>
    %209 = tpu.matmul %205, %206, %cst_65 {dimension_numbers = #tpu.dot_dimension_numbers<[1], [0], [0], [1], [0, 0, 1, 1], [], []>} : vector<8x32xf32>, vector<32x256xf32>, vector<8x256xf32> -> vector<8x256xf32>
    %210 = vector.broadcast %207 : vector<1x256xf32> to vector<8x256xf32>
    %211 = arith.addf %209, %210 : vector<8x256xf32>
    %cst_66 = arith.constant 0.000000e+00 : f32
    %212 = vector.broadcast %cst_66 : f32 to vector<8x256xf32>
    %213 = arith.maximumf %211, %212 : vector<8x256xf32>
    %cst_67 = arith.constant dense<0.000000e+00> : vector<8x32xf32>
    %214 = tpu.matmul %213, %208, %cst_67 {dimension_numbers = #tpu.dot_dimension_numbers<[1], [0], [0], [1], [0, 0, 1, 1], [], []>} : vector<8x256xf32>, vector<256x32xf32>, vector<8x32xf32> -> vector<8x32xf32>
    %215 = vector.broadcast %15 : vector<1x32xf32> to vector<8x32xf32>
    %216 = arith.addf %214, %215 : vector<8x32xf32>
    %217 = arith.addf %216, %205 : vector<8x32xf32>
    %cst_68 = arith.constant dense<0.000000e+00> : vector<8xf32>
    %218 = vector.multi_reduction <add>, %217, %cst_68 [1] : vector<8x32xf32> to vector<8xf32>
    %219 = vector.shape_cast %218 : vector<8xf32> to vector<8x1xf32>
    %cst_69 = arith.constant 3.200000e+01 : f32
    %220 = vector.broadcast %cst_69 : f32 to vector<8x1xf32>
    %221 = arith.divf %219, %220 : vector<8x1xf32>
    %222 = vector.broadcast %221 : vector<8x1xf32> to vector<8x32xf32>
    %223 = arith.subf %217, %222 : vector<8x32xf32>
    %224 = arith.mulf %223, %223 : vector<8x32xf32>
    %cst_70 = arith.constant dense<0.000000e+00> : vector<8xf32>
    %225 = vector.multi_reduction <add>, %224, %cst_70 [1] : vector<8x32xf32> to vector<8xf32>
    %226 = vector.shape_cast %225 : vector<8xf32> to vector<8x1xf32>
    %cst_71 = arith.constant 3.200000e+01 : f32
    %227 = vector.broadcast %cst_71 : f32 to vector<8x1xf32>
    %228 = arith.divf %226, %227 : vector<8x1xf32>
    %229 = vector.broadcast %221 : vector<8x1xf32> to vector<8x32xf32>
    %230 = arith.subf %217, %229 : vector<8x32xf32>
    %cst_72 = arith.constant 9.99999974E-6 : f32
    %231 = vector.broadcast %cst_72 : f32 to vector<8x1xf32>
    %232 = arith.addf %228, %231 : vector<8x1xf32>
    %233 = math.rsqrt %232 : vector<8x1xf32>
    %234 = vector.broadcast %233 : vector<8x1xf32> to vector<8x32xf32>
    %235 = arith.mulf %230, %234 : vector<8x32xf32>
    %236 = vector.broadcast %16 : vector<1x32xf32> to vector<8x32xf32>
    %237 = arith.mulf %235, %236 : vector<8x32xf32>
    %238 = vector.broadcast %17 : vector<1x32xf32> to vector<8x32xf32>
    %239 = arith.addf %237, %238 : vector<8x32xf32>
    %c0_73 = arith.constant 0 : index
    %c0_74 = arith.constant 0 : index
    %c0_75 = arith.constant 0 : index
    %240 = vector.load %arg10[%c0_73, %c0_74, %c0_75] : memref<1x8x32xf32, #tpu.memory_space<vmem>>, vector<1x8x32xf32>
    %241 = vector.shape_cast %240 : vector<1x8x32xf32> to vector<8x32xf32>
    %242 = vector.shape_cast %239 : vector<8x32xf32> to vector<1x8x32xf32>
    tpu.vector_store %arg10[%c0_73, %c0_74, %c0_75], %242 {strides = array<i32>} : memref<1x8x32xf32, #tpu.memory_space<vmem>>, vector<1x8x32xf32>,
    return
  }
  func.func @transform_0(%arg0: i32) -> (i32, i32, i32) {
    %c0_i32 = arith.constant 0 : i32
    %c0_i32_0 = arith.constant 0 : i32
    %c0_i32_1 = arith.constant 0 : i32
    return %arg0, %c0_i32, %c0_i32_0 : i32, i32, i32
  }
  func.func @transform_1(%arg0: i32) -> (i32, i32) {
    %c0_i32 = arith.constant 0 : i32
    %c0_i32_0 = arith.constant 0 : i32
    %c0_i32_1 = arith.constant 0 : i32
    return %c0_i32, %c0_i32_0 : i32, i32
  }
  func.func @transform_2(%arg0: i32) -> (i32, i32) {
    %c0_i32 = arith.constant 0 : i32
    %c0_i32_0 = arith.constant 0 : i32
    %c0_i32_1 = arith.constant 0 : i32
    return %c0_i32, %c0_i32_0 : i32, i32
  }
  func.func @transform_3(%arg0: i32) -> (i32, i32) {
    %c0_i32 = arith.constant 0 : i32
    %c0_i32_0 = arith.constant 0 : i32
    %c0_i32_1 = arith.constant 0 : i32
    return %c0_i32, %c0_i32_0 : i32, i32
  }
  func.func @transform_4(%arg0: i32) -> (i32, i32) {
    %c0_i32 = arith.constant 0 : i32
    %c0_i32_0 = arith.constant 0 : i32
    %c0_i32_1 = arith.constant 0 : i32
    return %c0_i32, %c0_i32_0 : i32, i32
  }
  func.func @transform_5(%arg0: i32) -> (i32, i32) {
    %c0_i32 = arith.constant 0 : i32
    %c0_i32_0 = arith.constant 0 : i32
    %c0_i32_1 = arith.constant 0 : i32
    return %c0_i32, %c0_i32_0 : i32, i32
  }
  func.func @transform_6(%arg0: i32) -> (i32, i32) {
    %c0_i32 = arith.constant 0 : i32
    %c0_i32_0 = arith.constant 0 : i32
    %c0_i32_1 = arith.constant 0 : i32
    return %c0_i32, %c0_i32_0 : i32, i32
  }
  func.func @transform_7(%arg0: i32) -> (i32, i32) {
    %c0_i32 = arith.constant 0 : i32
    %c0_i32_0 = arith.constant 0 : i32
    %c0_i32_1 = arith.constant 0 : i32
    return %c0_i32, %c0_i32_0 : i32, i32
  }
  func.func @transform_8(%arg0: i32) -> (i32, i32) {
    %c0_i32 = arith.constant 0 : i32
    %c0_i32_0 = arith.constant 0 : i32
    %c0_i32_1 = arith.constant 0 : i32
    return %c0_i32, %c0_i32_0 : i32, i32
  }
  func.func @transform_9(%arg0: i32) -> (i32, i32, i32) {
    %c0_i32 = arith.constant 0 : i32
    %c0_i32_0 = arith.constant 0 : i32
    %c0_i32_1 = arith.constant 0 : i32
    return %arg0, %c0_i32, %c0_i32_0 : i32, i32, i32
  }
}

</mosaic_0001>

<bundles_post_ra>
// kernel: transformer_block_forward.1
= control target key start
LH: loop header
LB: loop body
LE: loop exit
PB: predicated region body
PF: predicated region fallthrough
CT: control target
= control target key end

     0   :  { %14 = vsyncpa [#allocation3], 0  ;;  %s3405_s0 = inlined_call_operand.vmem [shape: f32[2,8,32], index: 0, kind: input, shape index: {}]   ;;  %s3406_s1 = inlined_call_operand.vmem [shape: f32[32,96], index: 1, kind: input, shape index: {}]   ;;  %s3407_s2 = inlined_call_operand.vmem [shape: f32[32,32], index: 2, kind: input, shape index: {}]   ;;  %s3408_s3 = inlined_call_operand.vmem [shape: f32[32,96], index: 3, kind: input, shape index: {}]   ;;  %s3409_s4 = inlined_call_operand.vmem [shape: f32[32,32], index: 4, kind: input, shape index: {}]   ;;  %s3410_s5 = inlined_call_operand.vmem [shape: f32[32,256], index: 5, kind: input, shape index: {}]   ;;  %s3411_s6 = inlined_call_operand.vmem [shape: f32[1,256], index: 6, kind: input, shape index: {}]   ;;  %s3412_s7 = inlined_call_operand.vmem [shape: f32[256,32], index: 7, kind: input, shape index: {}]   ;;  %s3413_s8 = inlined_call_operand.vmem [shape: f32[9,32], index: 8, kind: input, shape index: {}]   ;;  %s3414_s9 = inlined_call_operand.hbm [shape: f32[2,8,32], index: 9, kind: output, shape index: {}]  }
   0x1   :  { %16 = vsyncpa [#allocation3 + $0x1], 0  ;;  %s2897_s30 = smov 0   ;;  %s2899_s10 = smov 0  }
   0x2   :  { %s2901_s11 = smov 0   ;;  %s2903_s12 = smov 0  }
   0x3 LB: > { %s2918_s13 = sadd.s32 4294967295, %s2826_s12   ;;  %s2354_s14 = sadd.s32 4294967294, %s2826_s12   ;;  %s2826_s12 = sphi %s2903_s12, %s3440_s12   ;;  %s2822_s11 = sphi %s2901_s11, %s3439_s11   ;;  %s2818_s10 = sphi %s2899_s10, %s3438_s10   ;;  %s2814_s30 = sphi %s2897_s30, %s3437_s30  }
   0x4   : > { %s2922_s15 = sadd.s32 1, %s2826_s12   ;;  %s223_s16 = sadd.s32 1, %s2822_s11 }
   0x5   : > { %s220_s17 = ssub.s32 %s2826_s12, %s2922_s15  ;;  %p233_p0 = scmp.ne.s32.totalorder %s2822_s11, %s2818_s10 }
   0x6   : > { %p221_p1 = scmp.eq.s32.totalorder %s220_s17, 0  ;;  %p234_p2 = scmp.eq.s32.totalorder %s2918_s13, 1 }
   0x7   : > { %p239_p3 = scmp.ne.s32.totalorder %s2818_s10, %s2814_s30  ;;  %p240_p4 = scmp.eq.s32.totalorder %s2354_s14, 1 }
   0x8   : > { %s2933_s18 = scalar_select %p221_p1, %s2822_s11, %s223_s16  }
   0x9   : > { %p2935_p5 = por %p234_p2, %p233_p0  ;;  %p2939_p6 = por %p240_p4, %p239_p3 }
   0xa   : > { %p2357_p7 = scmp.ge.s32.totalorder %s2826_s12, 1  ;;  %p289_p8 = scmp.lt.s32.totalorder %s2826_s12, 3 }
   0xc   : > { %p290_p9 = pnand %p2357_p7, %p289_p8 }
   0xd   : > { %v337_v0 = vld [vmem:[%s3406_s1] sm:$0xff] (!%p290_p9)  ;;  %v338_v1 = vld [vmem:[%s3406_s1 + $0x8] sm:$0xff] (!%p290_p9)  ;;  %v339_v2 = vld [vmem:[%s3406_s1 + $0x10] sm:$0xff] (!%p290_p9)  ;;  %v2828_v3 = vmov (!%p290_p9), 0.0|0.0   ;;  %vm2829_vm0 = vmmov (!%p290_p9), 0   ;;  %v2830_v6 = vmov (!%p290_p9), 0.0   ;;  %v329_v18 = vlaneseq (!%p290_p9) }
   0xe   : > { %293 = sbr.rel (%p290_p9) target bundleno = 4334 (0x10ee), region = 56  ;;  %2605 = vmatprep.subr.bf16.mxu1 (!%p290_p9), %v2828_v3  ;;  %v2606_v4 = vpack.c.bf16 (!%p290_p9), %v338_v1, %v337_v0  ;;  %v340_v5 = vld [vmem:[%s3406_s1 + $0x18] sm:$0xff] (!%p290_p9)  ;;  %2489 = vmatprep.mubr.msk.f32.mxu1 (!%p290_p9), %vm2829_vm0, %v2830_v6  ;;  %p324_p10 = scmp.lt.s32.totalorder (!%p290_p9), %s2918_s13, 1  ;;  %vm345_vm1 = vcmask (!%p290_p9), 261120   ;;  %vm422_vm2 = vcmask (!%p290_p9), 64512   ;;  %vm1092_vm4 = vcmask (!%p290_p9), 130048  }
   0xf   : > { %2502 = vmatprep.subr.mxu0 (!%p290_p9), %v2830_v6  ;;  %2504 = vmatprep.mubr.msk.f32.mxu0 (!%p290_p9), %vm2829_vm0, %v2830_v6  ;;  %v2609_v7 = vpack.c.bf16 (!%p290_p9), %v340_v5, %v339_v2  ;;  %s2831_s22 = smov (!%p290_p9), 120   ;;  %s2832_s23 = smov (!%p290_p9), 96   ;;  %v3013_v19 = vshrl.u32 (!%p290_p9), %v329_v18, 7  ;;  %v332_v20 = vand.u32 (!%p290_p9), 127, %v329_v18  ;;  %v2838_v21 = vmov (!%p290_p9), -1e+09  }
  0x10   : > { %2607 = vmatpush3.bf16.msra.mxu1 (!%p290_p9), %v2606_v4  ;;  %s2833_s24 = smov (!%p290_p9), 80   ;;  %s2834_s25 = smov (!%p290_p9), 88   ;;  %vm1094_vm5 = vcmask (!%p290_p9), 195584  }
  0x11   : > { %2608 = vmatprep.subr.bf16.mxu1 (!%p290_p9), %v2828_v3  ;;  %s3424_s26 = smov (!%p290_p9), 72   ;;  %s3420_s27 = smov (!%p290_p9), 112   ;;  %vm333_vm3 = vcmp.ge.s32.totalorder (!%p290_p9), %v3013_v19, %v332_v20 }
  0x12   : > { %s3419_s28 = smov (!%p290_p9), 104   ;;  %v3016_v22 = vsel (!%p290_p9), %vm333_vm3, 0.0, %v2838_v21  ;;  %s3416_s16 = smov (!%p290_p9), 48  }
  0x13   : > { %s3415_s17 = smov (!%p290_p9), 40  }
  0x14   : > { %2610 = vmatpush3.bf16.msra.mxu1 (!%p290_p9), %v2609_v7 }
  0x15   : > { %s325_s29 = scalar_select %p324_p10, %s2918_s13, 1  ;;  %2492 = vmatprep.subr.mxu1 %v2830_v6 }
  0x17   : > { %s2359_s14 = sshll.u32 %s325_s29, 3  ;;  %s3418_s29 = smov 56  }
  0x18   : > { %s327_s21 = scalar_lea.vmem %s3405_s0, %s2359_s14  ;;  %s3417_s14 = smov 64  }
  0x19   : > { %v2969_v8 = vld [vmem:[%s327_s21] sm:$0xff] }
  0x1a   : > { %2490 = vmatmul.mubr.msk.f32.vlgmr.msra.gmra.mrb[0].mxu1 %vm345_vm1, %v2969_v8 }
  0x1b   : > { %2494 = vmatprep.mubr.msk.f32.mxu1 %vm2829_vm0, %v2830_v6 }
  0xed   : > { %v2976_v9 = vpop.f32.mrb[0].mxu1 }
  0xee   : > { %584 = vrot.lane.b32.xlu1 %v2976_v9, %s2831_s22  ;;  %420 = vrot.lane.b32.xlu0 %v2976_v9, %s2832_s23  ;;  %v2491_v10 = vpop.f32.mrb[1].mxu1 }
  0xf2   : > { %751 = vrot.lane.b32.xlu1 %v2976_v9, %s2833_s24  ;;  %586 = vrot.lane.b32.xlu0 %v2976_v9, %s2834_s25 }
  0xf6   : > { %916 = vrot.lane.b32.xlu1 %v2976_v9, %s3424_s26  ;;  %749 = vrot.lane.b32.xlu0 %v2976_v9, %s3420_s27  ;;  %s3427_s26 = smov 72  }
  0xfa   : > { %914 = vrot.lane.b32.xlu0 %v2976_v9, %s3419_s28  ;;  %s3434_s28 = smov 8  }
 0x160   : > { %v585_v11 = vpop.permute.xlu1 %584  ;;  %v421_v12 = vpop.permute.xlu0 %420 }
 0x161   : > { %2493 = vmatpush3.xpose.msk.msra.mxu1 %vm422_vm2, %v421_v12 }
 0x162   : > { %2497 = vmatprep.subr.mxu1 %v2830_v6 }
 0x164   : > { %2495 = vmatmul.mubr.msk.f32.vlgmr.msra.gmra.mrb[2].mxu1 %vm422_vm2, %v2976_v9  ;;  %v587_v13 = vpop.permute.xlu0 %586  ;;  %v752_v14 = vpop.permute.xlu1 %751 }
 0x165   : > { %2503 = vmatpush3.xpose.msk.msra.mxu0 %vm422_vm2, %v587_v13  ;;  %2499 = vmatprep.mubr.msk.f32.mxu1 %vm2829_vm0, %v2830_v6 }
 0x166   : > { %2512 = vmatprep.subr.mxu0 %v2830_v6 }
 0x168   : > { %2505 = vmatmul.mubr.msk.f32.vlgmr.msra.gmra.mrb[0].mxu0 %vm422_vm2, %v585_v11  ;;  %v750_v15 = vpop.permute.xlu0 %749  ;;  %v917_v16 = vpop.permute.xlu1 %916 }
 0x169   : > { %2513 = vmatpush3.xpose.msk.msra.mxu0 %vm422_vm2, %v752_v14  ;;  %2514 = vmatprep.mubr.msk.f32.mxu0 %vm2829_vm0, %v2830_v6  ;;  %v341_v14 = vld [vmem:[%s3407_s2] sm:$0xff] }
 0x16a   : > { %2522 = vmatprep.subr.mxu0 %v2830_v6 }
 0x16c   : > { %2515 = vmatmul.mubr.msk.f32.vlgmr.msra.gmra.mrb[2].mxu0 %vm422_vm2, %v750_v15  ;;  %v915_v17 = vpop.permute.xlu0 %914  ;;  %v342_v15 = vld [vmem:[%s3407_s2 + $0x8] sm:$0xff] }
 0x16d   : > { %2523 = vmatpush3.xpose.msk.msra.mxu0 %vm422_vm2, %v917_v16  ;;  %2524 = vmatprep.mubr.msk.f32.mxu0 %vm2829_vm0, %v2830_v6  ;;  %v2612_v16 = vpack.c.bf16 %v342_v15, %v341_v14 }
 0x16e   : > { %2554 = vmatprep.subr.mxu0 %v2830_v6 }
 0x170   : > { %2525 = vmatmul.mubr.msk.f32.vlgmr.msra.gmra.mrb[4].mxu0 %vm422_vm2, %v915_v17 }
 0x171   : > { %2556 = vmatprep.mubr.msk.f32.mxu0 %vm2829_vm0, %v2830_v6 }
 0x237   : > { %v493_v23 = vpop.f32.mrb[2].mxu1 }
 0x238   : > { %v494_v24 = vadd.f32 %v493_v23, %v3016_v22  ;;  %v2496_v25 = vpop.f32.mrb[3].mxu1  ;;  %v343_v23 = vld [vmem:[%s3407_s2 + $0x10] sm:$0xff] }
 0x23a   : > { %v497_v26 = vsel %vm422_vm2, %v494_v24, -inf }
 0x23b   : > { %v658_v27 = vpop.f32.mrb[0].mxu0  ;;  %498 = vmax.xlane.f32.xlu1 %v497_v26 }
 0x23c   : > { %v659_v28 = vadd.f32 %v658_v27, %v3016_v22  ;;  %v2506_v29 = vpop.f32.mrb[1].mxu0 }
 0x23e   : > { %v662_v30 = vsel %vm422_vm2, %v659_v28, -inf }
 0x23f   : > { %663 = vmax.xlane.f32.xlu0 %v662_v30  ;;  %v823_v31 = vpop.f32.mrb[2].mxu0 }
 0x240   : > { %v824_v32 = vadd.f32 %v823_v31, %v3016_v22  ;;  %v2516_v33 = vpop.f32.mrb[3].mxu0 }
 0x242   : > { %v827_v34 = vsel %vm422_vm2, %v824_v32, -inf }
 0x243   : > { %828 = vmax.xlane.f32.xlu0 %v827_v34  ;;  %v988_v35 = vpop.f32.mrb[4].mxu0 }
 0x244   : > { %v989_v36 = vadd.f32 %v988_v35, %v3016_v22  ;;  %v2526_v37 = vpop.f32.mrb[5].mxu0 }
 0x245   : > { %v3081_v37 = vld [vmem:[%s3413_s8] sm:$0xff] }
 0x246   : > { %v992_v38 = vsel %vm422_vm2, %v989_v36, -inf }
 0x247   : > { %993 = vmax.xlane.f32.xlu1 %v992_v38 }
 0x258   : > { %673 = vrot.lane.b32.xlu1 %v2976_v9, %s3418_s29  ;;  %s3423_s29 = smov 8  }
 0x2c8   : > { %v499_v39 = vpop.xlane.xlu1 %498 }
 0x2c9   : > { %v500_v40 = vsub.f32 %v494_v24, %v499_v39  ;;  %v344_v24 = vld [vmem:[%s3407_s2 + $0x18] sm:$0xff] }
 0x2ca   : > { %v2615_v25 = vpack.c.bf16 %v344_v24, %v343_v23 }
 0x2cb   : > { %v501_v41 = vmul.f32 1.442695, %v500_v40 }
 0x2cc   : > { %v664_v42 = vpop.xlane.xlu0 %663 }
 0x2cd   : > { %2726 = vpow2.f32 %v501_v41  ;;  %v665_v43 = vsub.f32 %v659_v28, %v664_v42 }
 0x2cf   : > { %v666_v44 = vmul.f32 1.442695, %v665_v43 }
 0x2d0   : > { %v829_v54 = vpop.xlane.xlu0 %828 }
 0x2d1   : > { %2728 = vpow2.f32 %v666_v44  ;;  %v830_v55 = vsub.f32 %v824_v32, %v829_v54 }
 0x2d3   : > { %v831_v56 = vmul.f32 1.442695, %v830_v55 }
 0x2d4   : > { %v994_v45 = vpop.xlane.xlu1 %993 }
 0x2d5   : > { %v995_v46 = vsub.f32 %v989_v36, %v994_v45  ;;  %v1098_v36 = vsub.s32 0, %v3013_v19 }
 0x2d7   : > { %v2727_v47 = vpop.eup %2726  ;;  %v996_v48 = vmul.f32 1.442695, %v995_v46  ;;  %v1099_v38 = vrot.slane %v3081_v37, %v1098_v36 }
 0x2d8   : > { %v503_v49 = vsel %vm422_vm2, %v2727_v47, 0.0  ;;  %v674_v59 = vpop.permute.xlu1 %673 }
 0x2d9   : > { %2730 = vpow2.f32 %v996_v48  ;;  %504 = vadd.xlane.f32.xlu0 %v503_v49  ;;  %v1198_v49 = vld [vmem:[%s3408_s3] sm:$0xff] }
 0x2da   : > { %2732 = vpow2.f32 %v831_v56 }
 0x2db   : > { %v2729_v50 = vpop.eup %2728 }
 0x2dc   : > { %v668_v51 = vsel %vm422_vm2, %v2729_v50, 0.0 }
 0x2dd   : > { %669 = vadd.xlane.f32.xlu1 %v668_v51 }
 0x2e3   : > { %v2731_v52 = vpop.eup %2730 }
 0x2e4   : > { %v998_v53 = vsel %vm422_vm2, %v2731_v52, 0.0  ;;  %v2733_v57 = vpop.eup %2732 }
 0x2e5   : > { %999 = vadd.xlane.f32.xlu1 %v998_v53  ;;  %v833_v58 = vsel %vm422_vm2, %v2733_v57, 0.0 }
 0x2ef   : > { %508 = vrot.lane.b32.xlu0 %v2976_v9, %s3417_s14  ;;  %s3422_s14 = smov 16  }
 0x2f6   : > { %838 = vrot.lane.b32.xlu1 %v2976_v9, %s3416_s16  ;;  %s3421_s16 = smov 24  }
 0x30e   : > { %834 = vadd.xlane.f32.xlu0 %v833_v58  ;;  %v1195_v58 = vsub.s32 2, %v3013_v19 }
 0x324   : > { %1003 = vrot.lane.b32.xlu0 %v2976_v9, %s3415_s17  ;;  %s2391_s17 = sshll.u32 %s2918_s13, 7  ;;  %s2846_s13 = smov [#allocation2]  }
 0x366   : > { %v505_v60 = vpop.xlane.xlu0 %504 }
 0x367   : > { %2734 = vrcp.f32 %v505_v60 }
 0x36a   : > { %v509_v61 = vpop.permute.xlu0 %508  ;;  %v670_v62 = vpop.xlane.xlu1 %669 }
 0x36b   : > { %2736 = vrcp.f32 %v670_v62  ;;  %2498 = vmatpush3.msra.mxu1 %v509_v61  ;;  %v1196_v62 = vrot.slane %v3081_v37, %v1195_v58 }
 0x36c   : > { %2507 = vmatprep.subr.mxu1 %v2830_v6 }
 0x371   : > { %v2735_v63 = vpop.eup %2734 }
 0x372   : > { %v507_v0 = vmul.f32 %v2735_v63, %v2727_v47  ;;  %v1000_v1 = vpop.xlane.xlu1 %999 }
 0x374   : > { %2500 = vmatmul.mubr.msk.f32.vlgmr.msra.gmra.mrb[4].mxu1 %vm422_vm2, %v507_v0 }
 0x375   : > { %v2737_v2 = vpop.eup %2736  ;;  %2508 = vmatpush3.msra.mxu1 %v674_v59  ;;  %2509 = vmatprep.mubr.msk.f32.mxu1 %vm2829_vm0, %v2830_v6 }
 0x376   : > { %v672_v4 = vmul.f32 %v2737_v2, %v2729_v50  ;;  %v839_v5 = vpop.permute.xlu1 %838  ;;  %2517 = vmatprep.subr.mxu1 %v2830_v6  ;;  %v1199_v50 = vld [vmem:[%s3408_s3 + $0x8] sm:$0xff] }
 0x377   : > { %v2618_v51 = vpack.c.bf16 %v1199_v50, %v1198_v49 }
 0x378   : > { %2510 = vmatmul.mubr.msk.f32.vlgmr.msra.gmra.mrb[6].mxu1 %vm422_vm2, %v672_v4 }
 0x379   : > { %2518 = vmatpush3.msra.mxu1 %v839_v5  ;;  %2519 = vmatprep.mubr.msk.f32.mxu1 %vm2829_vm0, %v2830_v6 }
 0x37a   : > { %2527 = vmatprep.subr.mxu1 %v2830_v6 }
 0x39b   : > { %v835_v7 = vpop.xlane.xlu0 %834 }
 0x39c   : > { %2738 = vrcp.f32 %v835_v7 }
 0x39d   : > { %2740 = vrcp.f32 %v1000_v1 }
 0x39f   : > { %v1004_v12 = vpop.permute.xlu0 %1003 }
 0x3a6   : > { %v2739_v9 = vpop.eup %2738 }
 0x3a7   : > { %v837_v10 = vmul.f32 %v2739_v9, %v2733_v57  ;;  %v2741_v11 = vpop.eup %2740  ;;  %v1190_v57 = vsub.s32 1, %v3013_v19 }
 0x3a8   : > { %v1002_v13 = vmul.f32 %v2741_v11, %v2731_v52  ;;  %v1201_v52 = vld [vmem:[%s3408_s3 + $0x18] sm:$0xff] }
 0x3a9   : > { %2520 = vmatmul.mubr.msk.f32.vlgmr.msra.gmra.mrb[8].mxu1 %vm422_vm2, %v837_v10  ;;  %v1191_v59 = vrot.slane %v3081_v37, %v1190_v57 }
 0x3aa   : > { %2528 = vmatpush3.msra.mxu1 %v1004_v12  ;;  %2529 = vmatprep.mubr.msk.f32.mxu1 %vm2829_vm0, %v2830_v6 }
 0x3ab   : > { %2611 = vmatprep.subr.bf16.mxu1 %v2828_v3 }
 0x3ad   : > { %2530 = vmatmul.mubr.msk.f32.vlgmr.msra.gmra.mrb[10].mxu1 %vm422_vm2, %v1002_v13 }
 0x3ae   : > { %2540 = vmatprep.mubr.msk.f32.mxu1 %vm2829_vm0, %v2830_v6  ;;  %2613 = vmatpush3.bf16.msra.mxu1 %v2612_v16 }
 0x3af   : > { %2614 = vmatprep.subr.bf16.mxu1 %v2828_v3 }
 0x3b2   : > { %2616 = vmatpush3.bf16.msra.mxu1 %v2615_v25 }
 0x3b3   : > { %2617 = vmatprep.subr.bf16.mxu1 %v2828_v3 }
 0x447   : > { %v580_v17 = vpop.f32.mrb[4].mxu1 }
 0x448   : > { %v2501_v18 = vpop.f32.mrb[5].mxu1 }
 0x44b   : > { %v745_v20 = vpop.f32.mrb[6].mxu1 }
 0x44c   : > { %1080 = vrot.lane.b32.xlu1 %v745_v20, %s3423_s29  ;;  %v2511_v21 = vpop.f32.mrb[7].mxu1  ;;  %s3428_s29 = smov 112  }
 0x47c   : > { %v910_v26 = vpop.f32.mrb[8].mxu1 }
 0x47d   : > { %1084 = vrot.lane.b32.xlu0 %v910_v26, %s3422_s14  ;;  %v2521_v27 = vpop.f32.mrb[9].mxu1  ;;  %s3429_s14 = smov 104  }
 0x480   : > { %v1075_v28 = vpop.f32.mrb[10].mxu1 }
 0x481   : > { %1088 = vrot.lane.b32.xlu1 %v1075_v28, %s3421_s16  ;;  %v2531_v29 = vpop.f32.mrb[11].mxu1 }
 0x4be   : > { %v1081_v30 = vpop.permute.xlu1 %1080 }
 0x4bf   : > { %v1091_v32 = vsel %vm422_vm2, %v580_v17, %v1081_v30 }
 0x4ef   : > { %v1085_v31 = vpop.permute.xlu0 %1084 }
 0x4f0   : > { %v1093_v33 = vsel %vm1092_vm4, %v1091_v32, %v1085_v31 }
 0x4f3   : > { %v1089_v34 = vpop.permute.xlu1 %1088 }
 0x4f4   : > { %v1095_v35 = vsel %vm1094_vm5, %v1093_v33, %v1089_v34 }
 0x4f5   : > { %2541 = vmatmul.mubr.msk.f32.vlgmr.msra.gmra.mrb[12].mxu1 %vm345_vm1, %v1095_v35 }
 0x4f6   : > { %2551 = vmatprep.mubr.msk.f32.mxu1 %vm2829_vm0, %v2830_v6  ;;  %2619 = vmatpush3.bf16.msra.mxu1 %v2618_v51 }
 0x4f7   : > { %2620 = vmatprep.subr.bf16.mxu1 %v2828_v3 }
 0x5c8   : > { %v1169_v39 = vpop.f32.mrb[12].mxu1 }
 0x5c9   : > { %v1170_v40 = vadd.f32 %v1169_v39, %v1099_v38  ;;  %v2542_v41 = vpop.f32.mrb[13].mxu1 }
 0x5cb   : > { %v1173_v42 = vadd.f32 %v1170_v40, %v2969_v8  ;;  %v1200_v8 = vld [vmem:[%s3408_s3 + $0x10] sm:$0xff] }
 0x5cc   : > { %v2621_v53 = vpack.c.bf16 %v1201_v52, %v1200_v8 }
 0x5cd   : > { %v1174_v43 = vsel %vm345_vm1, %v1173_v42, 0.0 }
 0x5ce   : > { %1175 = vadd.xlane.f32.xlu0 %v1174_v43  ;;  %2622 = vmatpush3.bf16.msra.mxu1 %v2621_v53 }
 0x5cf   : > { %2559 = vmatprep.subr.mxu1 %v2830_v6 }
 0x65b   : > { %v1176_v44 = vpop.xlane.xlu0 %1175 }
 0x65c   : > { %v1178_v45 = vmul.f32 0.03125, %v1176_v44 }
 0x65e   : > { %v1179_v46 = vsub.f32 %v1173_v42, %v1178_v45 }
 0x660   : > { %v1180_v47 = vmul.f32 %v1179_v46, %v1179_v46 }
 0x662   : > { %v1181_v48 = vsel %vm345_vm1, %v1180_v47, 0.0 }
 0x663   : > { %1182 = vadd.xlane.f32.xlu1 %v1181_v48 }
 0x6f0   : > { %v1183_v54 = vpop.xlane.xlu1 %1182 }
 0x6f1   : > { %v1184_v55 = vmul.f32 0.03125, %v1183_v54 }
 0x6f3   : > { %v1185_v56 = vadd.f32 1e-05, %v1184_v55 }
 0x6f5   : > { %2742 = vrsqrt.f32 %v1185_v56 }
 0x6ff   : > { %v2743_v60 = vpop.eup %2742 }
 0x700   : > { %v1187_v61 = vmul.f32 %v2743_v60, %v1179_v46 }
 0x702   : > { %v1192_v63 = vmul.f32 %v1191_v59, %v1187_v61 }
 0x704   : > { %v3109_v0 = vadd.f32 %v1196_v62, %v1192_v63 }
 0x706   : > { %2552 = vmatmul.mubr.msk.f32.vlgmr.msra.gmra.mrb[14].mxu1 %vm345_vm1, %v3109_v0 }
 0x707   : > { %2561 = vmatprep.mubr.msk.f32.mxu1 %vm2829_vm0, %v2830_v6 }
 0x7d9   : > { %v3115_v1 = vpop.f32.mrb[14].mxu1 }
 0x7da   : > { %1445 = vrot.lane.b32.xlu1 %v3115_v1, %s2834_s25  ;;  %1280 = vrot.lane.b32.xlu0 %v3115_v1, %s2832_s23  ;;  %v2553_v2 = vpop.f32.mrb[15].mxu1  ;;  %s3431_s23 = smov 64   ;;  %s3433_s25 = smov 40  }
 0x7de   : > { %1610 = vrot.lane.b32.xlu1 %v3115_v1, %s2833_s24  ;;  %1443 = vrot.lane.b32.xlu0 %v3115_v1, %s2831_s22  ;;  %s3430_s22 = smov 56   ;;  %s3432_s24 = smov 48  }
 0x7e2   : > { %1775 = vrot.lane.b32.xlu1 %v3115_v1, %s3427_s26  ;;  %1608 = vrot.lane.b32.xlu0 %v3115_v1, %s3428_s29  ;;  %s3362_s29 = scalar_lea.hbm %s3414_s9, %s2391_s17 }
 0x7e6   : > { %1773 = vrot.lane.b32.xlu0 %v3115_v1, %s3429_s14 }
 0x84c   : > { %v1446_v4 = vpop.permute.xlu1 %1445  ;;  %v1281_v5 = vpop.permute.xlu0 %1280 }
 0x84d   : > { %2555 = vmatpush3.xpose.msk.msra.mxu0 %vm422_vm2, %v1281_v5 }
 0x84e   : > { %2564 = vmatprep.subr.mxu0 %v2830_v6 }
 0x850   : > { %2557 = vmatmul.mubr.msk.f32.vlgmr.msra.gmra.mrb[6].mxu0 %vm422_vm2, %v3115_v1  ;;  %v1444_v7 = vpop.permute.xlu0 %1443  ;;  %v1611_v9 = vpop.permute.xlu1 %1610 }
 0x851   : > { %2565 = vmatpush3.xpose.msk.msra.mxu0 %vm422_vm2, %v1446_v4  ;;  %2566 = vmatprep.mubr.msk.f32.mxu0 %vm2829_vm0, %v2830_v6 }
 0x852   : > { %2574 = vmatprep.subr.mxu0 %v2830_v6 }
 0x854   : > { %2567 = vmatmul.mubr.msk.f32.vlgmr.msra.gmra.mrb[8].mxu0 %vm422_vm2, %v1444_v7  ;;  %v1609_v10 = vpop.permute.xlu0 %1608  ;;  %v1776_v11 = vpop.permute.xlu1 %1775  ;;  %v1202_v7 = vld [vmem:[%s3409_s4] sm:$0xff] }
 0x855   : > { %2575 = vmatpush3.xpose.msk.msra.mxu0 %vm422_vm2, %v1611_v9  ;;  %2576 = vmatprep.mubr.msk.f32.mxu0 %vm2829_vm0, %v2830_v6  ;;  %v1203_v9 = vld [vmem:[%s3409_s4 + $0x8] sm:$0xff] }
 0x856   : > { %2584 = vmatprep.subr.mxu0 %v2830_v6 }
 0x858   : > { %2577 = vmatmul.mubr.msk.f32.vlgmr.msra.gmra.mrb[10].mxu0 %vm422_vm2, %v1609_v10  ;;  %v1774_v12 = vpop.permute.xlu0 %1773  ;;  %v2624_v10 = vpack.c.bf16 %v1203_v9, %v1202_v7  ;;  %v2068_v7 = vld [vmem:[%s3412_s7 + $0x28] sm:$0xff]  ;;  %v2085_v9 = vld [vmem:[%s3412_s7 + $0xb0] sm:$0xff] }
 0x859   : > { %2585 = vmatpush3.xpose.msk.msra.mxu0 %vm422_vm2, %v1776_v11  ;;  %2586 = vmatprep.mubr.msk.f32.mxu0 %vm2829_vm0, %v2830_v6 }
 0x85a   : > { %2623 = vmatprep.subr.bf16.mxu0 %v2828_v3 }
 0x85c   : > { %2587 = vmatmul.mubr.msk.f32.vlgmr.msra.gmra.mrb[12].mxu0 %vm422_vm2, %v1774_v12 }
 0x85d   : > { %2602 = vmatprep.mubr.msk.f32.mxu0 %vm2829_vm0, %v2830_v6  ;;  %2625 = vmatpush3.bf16.msra.mxu0 %v2624_v10  ;;  %v2086_v10 = vld [vmem:[%s3412_s7 + $0xb8] sm:$0xff] }
 0x85e   : > { %2626 = vmatprep.subr.bf16.mxu0 %v2828_v3 }
 0x923   : > { %v1352_v13 = vpop.f32.mrb[6].mxu0 }
 0x924   : > { %v1353_v14 = vadd.f32 %v1352_v13, %v3016_v22  ;;  %v2558_v15 = vpop.f32.mrb[7].mxu0 }
 0x925   : > { %v1205_v15 = vld [vmem:[%s3409_s4 + $0x18] sm:$0xff] }
 0x926   : > { %v1356_v16 = vsel %vm422_vm2, %v1353_v14, -inf }
 0x927   : > { %1357 = vmax.xlane.f32.xlu1 %v1356_v16  ;;  %v1517_v17 = vpop.f32.mrb[8].mxu0 }
 0x928   : > { %v1518_v18 = vadd.f32 %v1517_v17, %v3016_v22  ;;  %v2568_v20 = vpop.f32.mrb[9].mxu0 }
 0x92a   : > { %v1521_v21 = vsel %vm422_vm2, %v1518_v18, -inf }
 0x92b   : > { %1522 = vmax.xlane.f32.xlu0 %v1521_v21  ;;  %v1682_v23 = vpop.f32.mrb[10].mxu0 }
 0x92c   : > { %v1683_v24 = vadd.f32 %v1682_v23, %v3016_v22  ;;  %v2578_v25 = vpop.f32.mrb[11].mxu0 }
 0x92e   : > { %v1686_v26 = vsel %vm422_vm2, %v1683_v24, -inf }
 0x92f   : > { %1687 = vmax.xlane.f32.xlu0 %v1686_v26  ;;  %v1847_v27 = vpop.f32.mrb[12].mxu0 }
 0x930   : > { %v1848_v28 = vadd.f32 %v1847_v27, %v3016_v22  ;;  %v2588_v29 = vpop.f32.mrb[13].mxu0 }
 0x932   : > { %v1851_v30 = vsel %vm422_vm2, %v1848_v28, -inf }
 0x933   : > { %1852 = vmax.xlane.f32.xlu1 %v1851_v30 }
 0x944   : > { %1532 = vrot.lane.b32.xlu1 %v3115_v1, %s3430_s22 }
 0x9b4   : > { %v1358_v31 = vpop.xlane.xlu1 %1357 }
 0x9b5   : > { %v1359_v32 = vsub.f32 %v1353_v14, %v1358_v31 }
 0x9b7   : > { %v1360_v33 = vmul.f32 1.442695, %v1359_v32 }
 0x9b8   : > { %v1523_v34 = vpop.xlane.xlu0 %1522 }
 0x9b9   : > { %2744 = vpow2.f32 %v1360_v33  ;;  %v1524_v35 = vsub.f32 %v1518_v18, %v1523_v34 }
 0x9bb   : > { %v1525_v38 = vmul.f32 1.442695, %v1524_v35 }
 0x9bc   : > { %v1688_v47 = vpop.xlane.xlu0 %1687 }
 0x9bd   : > { %2746 = vpow2.f32 %v1525_v38  ;;  %v1689_v48 = vsub.f32 %v1683_v24, %v1688_v47  ;;  %v2061_v47 = vld [vmem:[%s3410_s5 + $0x38] sm:$0xff] }
 0x9bf   : > { %v1690_v49 = vmul.f32 1.442695, %v1689_v48 }
 0x9c0   : > { %v1853_v39 = vpop.xlane.xlu1 %1852 }
 0x9c1   : > { %v1854_v40 = vsub.f32 %v1848_v28, %v1853_v39  ;;  %v1955_v28 = vsub.s32 3, %v3013_v19 }
 0x9c3   : > { %v2745_v41 = vpop.eup %2744  ;;  %v1855_v42 = vmul.f32 1.442695, %v1854_v40  ;;  %v1956_v29 = vrot.slane %v3081_v37, %v1955_v28  ;;  %v2092_v28 = vld [vmem:[%s3412_s7 + $0xe8] sm:$0xff] }
 0x9c4   : > { %v1362_v22 = vsel %vm422_vm2, %v2745_v41, 0.0  ;;  %v1533_v8 = vpop.permute.xlu1 %1532 }
 0x9c5   : > { %2748 = vpow2.f32 %v1855_v42  ;;  %1363 = vadd.xlane.f32.xlu0 %v1362_v22  ;;  %v2055_v42 = vld [vmem:[%s3410_s5 + $0x8] sm:$0xff] }
 0x9c6   : > { %2750 = vpow2.f32 %v1690_v49  ;;  %v2058_v49 = vld [vmem:[%s3410_s5 + $0x20] sm:$0xff] }
 0x9c7   : > { %v2747_v43 = vpop.eup %2746 }
 0x9c8   : > { %v1527_v44 = vsel %vm422_vm2, %v2747_v43, 0.0 }
 0x9c9   : > { %1528 = vadd.xlane.f32.xlu1 %v1527_v44  ;;  %v2056_v44 = vld [vmem:[%s3410_s5 + $0x10] sm:$0xff] }
 0x9cf   : > { %v2749_v45 = vpop.eup %2748 }
 0x9d0   : > { %v1857_v46 = vsel %vm422_vm2, %v2749_v45, 0.0  ;;  %v2751_v50 = vpop.eup %2750 }
 0x9d1   : > { %1858 = vadd.xlane.f32.xlu1 %v1857_v46  ;;  %v1692_v51 = vsel %vm422_vm2, %v2751_v50, 0.0  ;;  %v2059_v46 = vld [vmem:[%s3410_s5 + $0x28] sm:$0xff] }
 0x9d2   : > { %v2633_v48 = vpack.c.bf16 %v2061_v47, %v2059_v46  ;;  %v2094_v46 = vld [vmem:[%s3412_s7 + $0xf8] sm:$0xff] }
 0x9db   : > { %1367 = vrot.lane.b32.xlu0 %v3115_v1, %s3431_s23  ;;  %s3435_s23 = smov 16  }
 0x9e2   : > { %1697 = vrot.lane.b32.xlu1 %v3115_v1, %s3432_s24  ;;  %s3436_s24 = smov 24  }
 0x9fa   : > { %1693 = vadd.xlane.f32.xlu0 %v1692_v51 }
 0xa10   : > { %1862 = vrot.lane.b32.xlu0 %v3115_v1, %s3433_s25 }
 0xa52   : > { %v1364_v52 = vpop.xlane.xlu0 %1363 }
 0xa53   : > { %2752 = vrcp.f32 %v1364_v52  ;;  %v2080_v52 = vld [vmem:[%s3412_s7 + $0x88] sm:$0xff] }
 0xa56   : > { %v1529_v53 = vpop.xlane.xlu1 %1528  ;;  %v1368_v54 = vpop.permute.xlu0 %1367 }
 0xa57   : > { %2754 = vrcp.f32 %v1529_v53  ;;  %2560 = vmatpush3.msra.mxu1 %v1368_v54  ;;  %v2063_v53 = vld [vmem:[%s3412_s7] sm:$0xff] }
 0xa58   : > { %2569 = vmatprep.subr.mxu1 %v2830_v6 }
 0xa5d   : > { %v2753_v55 = vpop.eup %2752 }
 0xa5e   : > { %v1366_v56 = vmul.f32 %v2753_v55, %v2745_v41  ;;  %v1859_v58 = vpop.xlane.xlu1 %1858  ;;  %v2064_v55 = vld [vmem:[%s3412_s7 + $0x8] sm:$0xff] }
 0xa60   : > { %2562 = vmatmul.mubr.msk.f32.vlgmr.msra.gmra.mrb[16].mxu1 %vm422_vm2, %v1366_v56  ;;  %v2081_v56 = vld [vmem:[%s3412_s7 + $0x90] sm:$0xff] }
 0xa61   : > { %v2755_v59 = vpop.eup %2754  ;;  %2570 = vmatpush3.msra.mxu1 %v1533_v8  ;;  %2571 = vmatprep.mubr.msk.f32.mxu1 %vm2829_vm0, %v2830_v6  ;;  %v2079_v8 = vld [vmem:[%s3412_s7 + $0x80] sm:$0xff] }
 0xa62   : > { %v1531_v60 = vmul.f32 %v2755_v59, %v2747_v43  ;;  %v1698_v61 = vpop.permute.xlu1 %1697  ;;  %2579 = vmatprep.subr.mxu1 %v2830_v6  ;;  %v2054_v43 = vld [vmem:[%s3410_s5] sm:$0xff]  ;;  %v2637_v54 = vpack.c.bf16 %v2080_v52, %v2079_v8  ;;  %v2639_v59 = vpack.c.bf16 %v2064_v55, %v2063_v53 }
 0xa64   : > { %2572 = vmatmul.mubr.msk.f32.vlgmr.msra.gmra.mrb[18].mxu1 %vm422_vm2, %v1531_v60 }
 0xa65   : > { %2580 = vmatpush3.msra.mxu1 %v1698_v61  ;;  %2581 = vmatprep.mubr.msk.f32.mxu1 %vm2829_vm0, %v2830_v6  ;;  %v2065_v61 = vld [vmem:[%s3412_s7 + $0x10] sm:$0xff] }
 0xa66   : > { %2589 = vmatprep.subr.mxu1 %v2830_v6 }
 0xa87   : > { %v1694_v62 = vpop.xlane.xlu0 %1693 }
 0xa88   : > { %2756 = vrcp.f32 %v1694_v62  ;;  %v2066_v62 = vld [vmem:[%s3412_s7 + $0x18] sm:$0xff] }
 0xa89   : > { %2758 = vrcp.f32 %v1859_v58  ;;  %v2082_v58 = vld [vmem:[%s3412_s7 + $0x98] sm:$0xff] }
 0xa8a   : > { %v2641_v60 = vpack.c.bf16 %v2082_v58, %v2081_v56 }
 0xa8b   : > { %v1863_v4 = vpop.permute.xlu0 %1862 }
 0xa92   : > { %v2757_v63 = vpop.eup %2756 }
 0xa93   : > { %v1696_v1 = vmul.f32 %v2757_v63, %v2751_v50  ;;  %v2759_v2 = vpop.eup %2758  ;;  %v2060_v50 = vld [vmem:[%s3410_s5 + $0x30] sm:$0xff]  ;;  %v2083_v63 = vld [vmem:[%s3412_s7 + $0xa0] sm:$0xff] }
 0xa94   : > { %v1861_v5 = vmul.f32 %v2759_v2, %v2749_v45  ;;  %v2631_v45 = vpack.c.bf16 %v2056_v44, %v2054_v43  ;;  %v2635_v51 = vpack.c.bf16 %v2060_v50, %v2058_v49  ;;  %v2643_v2 = vpack.c.bf16 %v2066_v62, %v2065_v61  ;;  %v2075_v43 = vld [vmem:[%s3412_s7 + $0x60] sm:$0xff]  ;;  %v2076_v44 = vld [vmem:[%s3412_s7 + $0x68] sm:$0xff]  ;;  %v2078_v49 = vld [vmem:[%s3412_s7 + $0x78] sm:$0xff] }
 0xa95   : > { %2582 = vmatmul.mubr.msk.f32.vlgmr.msra.gmra.mrb[20].mxu1 %vm422_vm2, %v1696_v1  ;;  %v2084_v1 = vld [vmem:[%s3412_s7 + $0xa8] sm:$0xff] }
 0xa96   : > { %2590 = vmatpush3.msra.mxu1 %v1863_v4  ;;  %2591 = vmatprep.mubr.msk.f32.mxu1 %vm2829_vm0, %v2830_v6  ;;  %v2645_v4 = vpack.c.bf16 %v2084_v1, %v2083_v63 }
 0xa99   : > { %2592 = vmatmul.mubr.msk.f32.vlgmr.msra.gmra.mrb[22].mxu1 %vm422_vm2, %v1861_v5  ;;  %v2067_v5 = vld [vmem:[%s3412_s7 + $0x20] sm:$0xff] }
 0xa9a   : > { %2173 = vmatprep.mubr.f32.mxu1 %v2830_v6  ;;  %v1204_v6 = vld [vmem:[%s3409_s4 + $0x10] sm:$0xff] }
 0xa9b   : > { %v2627_v16 = vpack.c.bf16 %v1205_v15, %v1204_v6  ;;  %v2087_v6 = vld [vmem:[%s3412_s7 + $0xc0] sm:$0xff]  ;;  %v2088_v15 = vld [vmem:[%s3412_s7 + $0xc8] sm:$0xff] }
 0xa9d   : > { %2628 = vmatpush3.bf16.msra.mxu0 %v2627_v16 }
 0xa9e   : > { %2638 = vmatprep.subr.bf16.mxu0 %v2637_v54 }
 0xb33   : > { %v1439_v11 = vpop.f32.mrb[16].mxu1 }
 0xb34   : > { %v2563_v12 = vpop.f32.mrb[17].mxu1 }
 0xb35   : > { %v2649_v12 = vpack.c.bf16 %v2086_v10, %v2085_v9 }
 0xb37   : > { %v1604_v13 = vpop.f32.mrb[18].mxu1 }
 0xb38   : > { %1939 = vrot.lane.b32.xlu1 %v1604_v13, %s3434_s28  ;;  %v2573_v14 = vpop.f32.mrb[19].mxu1  ;;  %v2069_v13 = vld [vmem:[%s3412_s7 + $0x30] sm:$0xff] }
 0xb39   : > { %v2070_v14 = vld [vmem:[%s3412_s7 + $0x38] sm:$0xff] }
 0xb3a   : > { %v2651_v16 = vpack.c.bf16 %v2070_v14, %v2069_v13  ;;  %v2272_v14 = vsub.s32 7, %v3013_v19 }
 0xb68   : > { %v1769_v17 = vpop.f32.mrb[20].mxu1 }
 0xb69   : > { %1943 = vrot.lane.b32.xlu0 %v1769_v17, %s3435_s23  ;;  %v2583_v3 = vpop.f32.mrb[21].mxu1  ;;  %v2653_v17 = vpack.c.bf16 %v2088_v15, %v2087_v6  ;;  %s321_s23 = sand.u32 1, %s2818_s10   ;;  %v2273_v6 = vrot.slane %v3081_v37, %v2272_v14 }
 0xb6a   : > { %v2071_v3 = vld [vmem:[%s3412_s7 + $0x40] sm:$0xff]  ;;  %s2282_s14 = scalar_lea.sflag [#allocation3], %s321_s23 }
 0xb6c   : > { %v1934_v18 = vpop.f32.mrb[22].mxu1 }
 0xb6d   : > { %1947 = vrot.lane.b32.xlu1 %v1934_v18, %s3436_s24  ;;  %v2593_v20 = vpop.f32.mrb[23].mxu1  ;;  %v2072_v18 = vld [vmem:[%s3412_s7 + $0x48] sm:$0xff]  ;;  %s2358_s24 = sshll.u32 %s321_s23, 3 }
 0xb6e   : > { %v2089_v20 = vld [vmem:[%s3412_s7 + $0xd0] sm:$0xff]  ;;  %s323_s21 = scalar_lea.vmem [#allocation2], %s2358_s24  ;;  %s2768_s24 = sshll.u32 %s2846_s13, 4  ;;  %s2769_s24 = int_to_ptr.vmem [resolvable:$false] %s2768_s24 }
 0xb6f   : > { %s2295_s27 = sshll.u32 %s323_s21, 4  ;;  %s2770_s25 = scalar_lea.vmem %s2769_s24, 256  ;;  %s3364_s27 = int_to_ptr.vmem [resolvable:$true] %s2295_s27 }
 0xb70   : > { %s2764_s22 = scalar_lea.vmem %s3364_s27, 128  ;;  %p2771_p0 = scmp.lt.s32.totalorder %s3364_s27, %s2769_s24 }
 0xb71   : > { %p2765_p11 = scmp.ne.s32.totalorder %s3364_s27, %s2764_s22  ;;  %p2772_p1 = scmp.lt.s32.totalorder %s2770_s25, %s2764_s22 }
 0xb73   : > { %p2766_p12 = pnand %p2765_p11, %p2935_p5  ;;  %p2773_p2 = por %p2772_p1, %p2771_p0 }
 0xb75   : > { %p2767_p13 = pneg %p2766_p12 }
 0xb77   : > { %p2774_p3 = pnand %p2773_p2, %p2767_p13 }
 0xbaa   : > { %v1940_v21 = vpop.permute.xlu1 %1939 }
 0xbab   : > { %v1950_v24 = vsel %vm422_vm2, %v1439_v11, %v1940_v21  ;;  %v2647_v11 = vpack.c.bf16 %v2068_v7, %v2067_v5  ;;  %v2090_v21 = vld [vmem:[%s3412_s7 + $0xd8] sm:$0xff] }
 0xbdb   : > { %v1944_v23 = vpop.permute.xlu0 %1943 }
 0xbdc   : > { %v1951_v25 = vsel %vm1092_vm4, %v1950_v24, %v1944_v23  ;;  %v2655_v23 = vpack.c.bf16 %v2072_v18, %v2071_v3  ;;  %v2657_v24 = vpack.c.bf16 %v2090_v21, %v2089_v20 }
 0xbdf   : > { %v1948_v26 = vpop.permute.xlu1 %1947 }
 0xbe0   : > { %v1952_v27 = vsel %vm1094_vm5, %v1951_v25, %v1948_v26  ;;  %v2073_v25 = vld [vmem:[%s3412_s7 + $0x50] sm:$0xff]  ;;  %v2074_v26 = vld [vmem:[%s3412_s7 + $0x58] sm:$0xff] }
 0xbe1   : > { %2603 = vmatmul.mubr.msk.f32.vlgmr.msra.gmra.mrb[14].mxu0 %vm345_vm1, %v1952_v27  ;;  %v2091_v27 = vld [vmem:[%s3412_s7 + $0xe0] sm:$0xff] }
 0xbe2   : > { %2640 = vmatpush3.bf16.msra.mxu0 %v2639_v59 }
 0xbe3   : > { %2642 = vmatprep.subr.bf16.mxu0 %v2641_v60  ;;  %v2184_v60 = vsub.s32 6, %v3013_v19 }
 0xbe5   : > { %v2185_v62 = vrot.slane %v3081_v37, %v2184_v60 }
 0xbe6   : > { %2644 = vmatpush3.bf16.msra.mxu0 %v2643_v2 }
 0xbe7   : > { %2646 = vmatprep.subr.bf16.mxu0 %v2645_v4 }
 0xbea   : > { %2648 = vmatpush3.bf16.msra.mxu0 %v2647_v11 }
 0xbeb   : > { %2650 = vmatprep.subr.bf16.mxu0 %v2649_v12 }
 0xbee   : > { %2652 = vmatpush3.bf16.msra.mxu0 %v2651_v16 }
 0xbef   : > { %2654 = vmatprep.subr.bf16.mxu0 %v2653_v17  ;;  %v2389_v17 = vld [vmem:[%s3413_s8 + $0x8] ss:$0 sm:$0xff] }
 0xbf2   : > { %2656 = vmatpush3.bf16.msra.mxu0 %v2655_v23 }
 0xbf3   : > { %2658 = vmatprep.subr.bf16.mxu0 %v2657_v24 }
 0xcb4   : > { %v2026_v30 = vpop.f32.mrb[14].mxu0 }
 0xcb5   : > { %v2027_v31 = vadd.f32 %v2026_v30, %v1956_v29  ;;  %v2604_v32 = vpop.f32.mrb[15].mxu0  ;;  %v2659_v29 = vpack.c.bf16 %v2074_v26, %v2073_v25  ;;  %v2661_v30 = vpack.c.bf16 %v2092_v28, %v2091_v27 }
 0xcb7   : > { %v2030_v33 = vadd.f32 %v2027_v31, %v3109_v0  ;;  %v2057_v0 = vld [vmem:[%s3410_s5 + $0x18] sm:$0xff]  ;;  %2660 = vmatpush3.bf16.msra.mxu0 %v2659_v29 }
 0xcb8   : > { %v2629_v22 = vpack.c.bf16 %v2057_v0, %v2055_v42  ;;  %2662 = vmatprep.subr.bf16.mxu0 %v2661_v30 }
 0xcb9   : > { %v2031_v34 = vsel %vm345_vm1, %v2030_v33, 0.0 }
 0xcba   : > { %2032 = vadd.xlane.f32.xlu0 %v2031_v34  ;;  %2630 = vmatprep.subr.bf16.mxu1 %v2629_v22  ;;  %v2046_v34 = vsub.s32 4, %v3013_v19 }
 0xcbb   : > { %2632 = vmatpush1.bf16.msra.mxu1 %v2631_v45  ;;  %v2663_v45 = vpack.c.bf16 %v2076_v44, %v2075_v43 }
 0xcbc   : > { %2634 = vmatprep.subr.bf16.mxu1 %v2633_v48  ;;  %v2077_v48 = vld [vmem:[%s3412_s7 + $0x70] sm:$0xff] }
 0xcbd   : > { %2664 = vmatpush3.bf16.msra.mxu0 %v2663_v45  ;;  %v2667_v50 = vpack.c.bf16 %v2078_v49, %v2077_v48 }
 0xcbf   : > { %2636 = vmatpush1.bf16.msra.mxu1 %v2635_v51  ;;  %v2062_v51 = vld [vmem:[%s3411_s6] sm:$0x3] }
 0xcc0   : > { %v2099_v8 = vrot.slane %v2062_v51, %v1098_v36  ;;  %v2103_v52 = vrot.slane %v2062_v51, %v1190_v57 }
 0xd47   : > { %v2033_v35 = vpop.xlane.xlu0 %2032 }
 0xd48   : > { %v2034_v38 = vmul.f32 0.03125, %v2033_v35  ;;  %v2051_v35 = vsub.s32 5, %v3013_v19 }
 0xd4a   : > { %v3210_v39 = vsub.f32 %v2030_v33, %v2034_v38  ;;  %v2047_v38 = vrot.slane %v3081_v37, %v2046_v34  ;;  %v2052_v42 = vrot.slane %v3081_v37, %v2051_v35 }
 0xd4c   : > { %v2036_v40 = vmul.f32 %v3210_v39, %v3210_v39 }
 0xd4e   : > { %v2037_v41 = vsel %vm345_vm1, %v2036_v40, 0.0 }
 0xd4f   : > { %2038 = vadd.xlane.f32.xlu1 %v2037_v41 }
 0xddc   : > { %v2039_v31 = vpop.xlane.xlu1 %2038 }
 0xddd   : > { %v2040_v32 = vmul.f32 0.03125, %v2039_v31 }
 0xddf   : > { %v2041_v33 = vadd.f32 1e-05, %v2040_v32 }
 0xde1   : > { %2760 = vrsqrt.f32 %v2041_v33 }
 0xdeb   : > { %v2761_v40 = vpop.eup %2760 }
 0xdec   : > { %v2043_v41 = vmul.f32 %v2761_v40, %v3210_v39  ;;  %v2093_v39 = vld [vmem:[%s3412_s7 + $0xf0] sm:$0xff] }
 0xded   : > { %v2665_v47 = vpack.c.bf16 %v2094_v46, %v2093_v39 }
 0xdee   : > { %v2048_v0 = vmul.f32 %v2047_v38, %v2043_v41 }
 0xdef   : > { %2666 = vmatprep.subr.bf16.mxu0 %v2665_v47 }
 0xdf0   : > { %v2053_v22 = vadd.f32 %v2052_v42, %v2048_v0  ;;  %2668 = vmatpush3.bf16.msra.mxu0 %v2667_v50 }
 0xdf2   : > { %2388 = vmatmul.mubr.msk.f32.vlgmr.msra.gmra.mrb[24].mxu1 %vm345_vm1, %v2053_v22 }
 0xec5   : > { %v2175_v53 = vpop.f32.mrb[24].mxu1 }
 0xec6   : > { %v2176_v54 = vadd.f32 %v2175_v53, %v2099_v8  ;;  %v2177_v55 = vpop.f32.mrb[25].mxu1 }
 0xec7   : > { %v2178_v56 = vadd.f32 %v2177_v55, %v2103_v52 }
 0xec8   : > { %v2180_v59 = vmax.f32 %v2176_v54, 0.0 }
 0xec9   : > { %v2181_v58 = vmax.f32 %v2178_v56, 0.0 }
 0xecb   : > { %2250 = vmatprep.mubr.f32.mxu0 %v2181_v58 }
 0xecc   : > { %2251 = vmatmul.mubr.f32.vlgmr.msra.gmra.mrb[16].mxu0 %v2180_v59 }
 0xf9f   : > { %v2478_v61 = vpop.f32.mrb[16].mxu0 }
 0xfa0   : > { %v2479_v63 = vpop.f32.mrb[17].mxu0 }
 0xfa1   : > { %v2480_v1 = vadd.f32 %v2479_v63, %v2478_v61 }
 0xfa3   : > { %v2253_v36 = vadd.f32 %v2480_v1, %v2185_v62 }
 0xfa5   : > { %v2256_v2 = vadd.f32 %v2253_v36, %v2053_v22 }
 0xfa7   : > { %v2257_v57 = vsel %vm345_vm1, %v2256_v2, 0.0 }
 0xfa8   : > { %2258 = vadd.xlane.f32.xlu0 %v2257_v57 }
0x1035   : > { %v2259_v4 = vpop.xlane.xlu0 %2258 }
0x1036   : > { %v2260_v5 = vmul.f32 0.03125, %v2259_v4 }
0x1038   : > { %v2261_v7 = vsub.f32 %v2256_v2, %v2260_v5 }
0x103a   : > { %v2262_v9 = vmul.f32 %v2261_v7, %v2261_v7 }
0x103c   : > { %v2263_v10 = vsel %vm345_vm1, %v2262_v9, 0.0 }
0x103d   : > { %2264 = vadd.xlane.f32.xlu0 %v2263_v10 }
0x10ca   : > { %v2265_v11 = vpop.xlane.xlu0 %2264 }
0x10cb   : > { %v2266_v12 = vmul.f32 0.03125, %v2265_v11 }
0x10cd   : > { %v2267_v13 = vadd.f32 1e-05, %v2266_v12 }
0x10cf   : > { %2762 = vrsqrt.f32 %v2267_v13 }
0x10d9   : > { %v2763_v15 = vpop.eup %2762 }
0x10da   : > { %v2269_v16 = vmul.f32 %v2763_v15, %v2261_v7 }
0x10dc   : > { %v2274_v3 = vmul.f32 %v2273_v6, %v2269_v16 }
0x10de   : > { %v2279_v18 = vadd.f32 %v2389_v17, %v2274_v3 }
0x10e0   : > { %2280 = vst.msk [vmem:[%s323_s21] sm:$0xff] %vm345_vm1, %v2279_v18 }
0x10e1   : > { %2777 = shalt.err (!%p2774_p3)
}
0x10e2   : > { %s2778_s23 = scalar_lea.hbm %s3362_s29, 128  ;;  %s2782_s21 = scalar_lea.hbm %s3414_s9, 256 }
0x10e3   : > { %p2779_p4 = scmp.ne.s32.totalorder %s3362_s29, %s2778_s23  ;;  %p2783_p9 = scmp.lt.u32.totalorder %s3362_s29, %s3414_s9 }
0x10e4   : > { %p2784_p10 = scmp.lt.u32.totalorder %s2782_s21, %s2778_s23  ;;  %p2786_p12 = scmp.lt.u32.totalorder %s2778_s23, %s3362_s29 }
0x10e5   : > { %p2780_p7 = pnand %p2779_p4, %p2935_p5 }
0x10e6   : > { %p2785_p11 = por %p2784_p10, %p2783_p9 }
0x10e7   : > { %p2781_p8 = pneg %p2780_p7 }
0x10e8   : > { %p2787_p13 = por %p2786_p12, %p2785_p11 }
0x10ea   : > { %p2788_p0 = pnand %p2787_p13, %p2781_p8 }
0x10ec   : > { %2791 = shalt.err (!%p2788_p0)
}
0x10ed   : > { %2669 = dma.vmem_to_hbm [thread:$0]  (%p2935_p5), %s3364_s27, 128, %s3362_s29, %s2282_s14  }
0x10ee PF: > { %p2675_p1 = scmp.ge.s32.totalorder %s2826_s12, 2  ;;  %s2307_s22 = sand.u32 1, %s2814_s30  }
0x10ef   : > { %s2308_s13 = scalar_lea.sflag [#allocation3], %s2307_s22 }
0x10f0   : > { %p2672_p2 = pnand %p2675_p1, %p2939_p6 }
0x10f2   : > { %2809 = dma.done.wait (!%p2672_p2), %s2308_s13, 128  }
0x10f3   : > { %2811 = vsyncadd (!%p2672_p2), %s2308_s13, 4294967168  ;;  %p19_p3 = scmp.ge.s32.totalorder %s2922_s15, 4   ;;  %s3437_s30 = smov %s2818_s10 }
0x10f4   : > { %s3438_s10 = smov %s2822_s11  ;;  %s3439_s11 = smov %s2933_s18 }
0x10f5   : > { %s3440_s12 = smov %s2922_s15  ;;  %21 = sbr.rel (!%p19_p3) target bundleno = 3 (0x3), region = 91 }
0x10fc   :  { %2313 = vsyncpa [#allocation3], 1 }
0x10fd   :  { %2315 = vsyncpa [#allocation3 + $0x1], 1 }

</bundles_post_ra>
